<compile_context>
chip_gen: v7x
topology: tpu7x:2x2x1
jax: 0.10.0
libtpu: 0.0.40
codegen_flags: <defaults>
</compile_context>

<pallas_src>
import functools

import jax
import jax.numpy as jnp
from jax.experimental import pallas as pl
from jax.experimental.pallas import tpu as pltpu


def _ami_kernel(
    x_ref,      # ((S+1)*Bp, Din)  time-major input (+ one zero row-block)
    wih0p_ref,  # (Din, 8H)        layer-0 input weight, gate-interleaved cols
    bpack_ref,  # (1, 8H)          combined biases, gate-interleaved
    wpack_ref,  # (2H, 8H)         fused recurrent weight [[whh0,wih1],[0,whh1]]
    wlin_ref,   # (2H, Doutp)      head weight (rows [0:H) are zero)
    blin_ref,   # (1, Doutp)
    y_ref,      # (S*Bp, Doutp)
    xw0_s,      # ((S+1)*Bp, 8H)   scratch: x @ wih0p + biases, all ticks
    hall_s,     # (S*Bp, 2H)       scratch: packed hidden per step (h1 in [H:2H))
    *,
    seq_len,
    batch_p,
    hidden,
):
    S, Bp, H = seq_len, batch_p, hidden
    H2, H4, H6, H8 = 2 * H, 4 * H, 6 * H, 8 * H

    # One hoisted MXU call for every timestep's input projection, biases
    # folded into the epilogue add.  Packed gate column order is
    # [i0,i1,f0,f1,g0,g1,o0,o1]; layer-1 "input" columns of wih0p are zero.
    xw0_s[...] = (jnp.dot(x_ref[...], wih0p_ref[...],
                          preferred_element_type=jnp.float32)
                  + bpack_ref[...])

    wpack = wpack_ref[...]  # resident fused recurrent weight (16 vregs at H=32)

    lane8 = jax.lax.broadcasted_iota(jnp.int32, (Bp, H8), 1)
    is_g = (lane8 >= H4) & (lane8 < H6)      # g-gate lanes (both layers)
    gmul = jnp.where(is_g, 2.0, 1.0)         # pre-scale for tanh-via-sigmoid
    lane2 = jax.lax.broadcasted_iota(jnp.int32, (Bp, H2), 1)
    is_l0 = lane2 < H                        # layer-0 half of the packed state

    def activate(gates):
        # Single EUP pass: sigmoid everywhere; g lanes become tanh via
        # tanh(x) = 2*sigmoid(2x) - 1 (the mul/fma land in spare VALU slots).
        s = jax.nn.sigmoid(gates * gmul)
        return jnp.where(is_g, 2.0 * s - 1.0, s)

    def cell(a, cpack):
        ip = a[:, 0:H2]
        fp = a[:, H2:H4]
        gp = a[:, H4:H6]
        op = a[:, H6:H8]
        c_new = fp * cpack + ip * gp
        h_new = op * jnp.tanh(c_new)
        return h_new, c_new

    # Tick 0 (peeled): only layer 0 is live.  Packed state starts at zero, so
    # the recurrent matmul term vanishes; the layer-1 half of the result is
    # masked back to the zero initial state.
    zero2 = jnp.zeros((Bp, H2), jnp.float32)
    h_new, c_new = cell(activate(xw0_s[0:Bp, :]), zero2)
    hpack = jnp.where(is_l0, h_new, 0.0)
    cpack = jnp.where(is_l0, c_new, 0.0)

    # Ticks 1..S: wavefront — layer 0 of step k and layer 1 of step k-1 share
    # ONE fused matmul, ONE activation pass and ONE packed cell update.
    def tick(k, carry):
        hpack, cpack = carry
        row = pl.multiple_of(k * Bp, Bp)
        prev = pl.multiple_of((k - 1) * Bp, Bp)
        gates = (xw0_s[pl.ds(row, Bp), :]
                 + jnp.dot(hpack, wpack, preferred_element_type=jnp.float32))
        h_new, c_new = cell(activate(gates), cpack)
        hall_s[pl.ds(prev, Bp), :] = h_new   # lanes [H:2H) hold h1_{k-1}
        return h_new, c_new

    jax.lax.fori_loop(1, S + 1, tick, (hpack, cpack), unroll=True)

    # Batched, lane-dense linear head: rows [0:H) of wlin are zero, so only
    # the layer-1 half of the packed hidden contributes.  Single wide store.
    y = (jnp.dot(hall_s[...], wlin_ref[...],
                 preferred_element_type=jnp.float32)
         + blin_ref[...])
    y_ref[...] = y.astype(y_ref.dtype)


def _full_spec(shape):
    n = len(shape)
    return pl.BlockSpec(shape, lambda i: (0,) * n)


def ami_test_forward(x, params):
    """x: (seq_len, batch, input_dim) float32 -> (seq_len, batch, output_dim)."""
    S, B, Din = x.shape
    wih0, whh0, b0, wih1, whh1, b1, wlin, blin = params
    H = whh0.shape[0]
    H4 = 4 * H
    Dout = wlin.shape[1]

    # Pad batch to the f32 sublane tile and the head output to a full lane tile.
    Bp = max(8, ((B + 7) // 8) * 8)
    Doutp = ((Dout + 127) // 128) * 128

    def interleave(wa, wb):
        # (K,4H),(K,4H) -> (K,8H) with H-wide blocks [a_i,b_i,a_f,b_f,a_g,b_g,a_o,b_o]
        parts = []
        for g in range(4):
            parts.append(wa[:, g * H:(g + 1) * H])
            parts.append(wb[:, g * H:(g + 1) * H])
        return jnp.concatenate(parts, axis=1)

    zeros4 = jnp.zeros((Din, H4), jnp.float32)
    wih0p = interleave(wih0, zeros4)                           # (Din, 8H)
    bpack = interleave(b0, b1)                                 # (1, 8H)
    wpack = jnp.concatenate(
        [interleave(whh0, wih1),
         interleave(jnp.zeros((H, H4), jnp.float32), whh1)], axis=0)  # (2H, 8H)
    wlin_big = jnp.concatenate(
        [jnp.zeros((H, Doutp), jnp.float32),
         jnp.pad(wlin, ((0, 0), (0, Doutp - Dout)))], axis=0)  # (2H, Doutp)
    blin_p = jnp.pad(blin, ((0, 0), (0, Doutp - Dout)))        # (1, Doutp)

    if Bp != B:
        x = jnp.pad(x, ((0, 0), (0, Bp - B), (0, 0)))
    # Append one zero timestep so the final wavefront tick is uniform.
    xp = jnp.concatenate([x, jnp.zeros((1, Bp, Din), x.dtype)], axis=0)
    x2d = xp.reshape((S + 1) * Bp, Din)

    kernel = functools.partial(_ami_kernel, seq_len=S, batch_p=Bp, hidden=H)

    y2d = pl.pallas_call(
        kernel,
        out_shape=jax.ShapeDtypeStruct((S * Bp, Doutp), jnp.float32),
        grid=(1,),
        in_specs=[
            _full_spec(x2d.shape),
            _full_spec(wih0p.shape),
            _full_spec(bpack.shape),
            _full_spec(wpack.shape),
            _full_spec(wlin_big.shape),
            _full_spec(blin_p.shape),
        ],
        out_specs=pl.BlockSpec((S * Bp, Doutp), lambda i: (0, 0)),
        scratch_shapes=[
            pltpu.VMEM(((S + 1) * Bp, 8 * H), jnp.float32),  # input proj + biases
            pltpu.VMEM((S * Bp, 2 * H), jnp.float32),        # packed hidden per step
        ],
        compiler_params=pltpu.CompilerParams(
            dimension_semantics=("arbitrary",),
        ),
    )(x2d, wih0p, bpack, wpack, wlin_big, blin_p)

    return y2d.reshape(S, Bp, Doutp)[:, :B, :Dout]


def init_params(key, input_dim, hidden_dim, output_dim):
    """Deterministic parameters matching PyTorch nn.LSTM / nn.Linear shapes.

    PyTorch stores weight_ih_l{k}: (4H, in), weight_hh_l{k}: (4H, H); we keep
    the pre-transposed (in, 4H)/(H, 4H) form (gate order i,f,g,o) and fold
    b_ih + b_hh into a single (1, 4H) bias per layer.
    """
    ks = jax.random.split(key, 12)
    scale = 0.1
    H4 = 4 * hidden_dim

    wih0 = scale * jax.random.normal(ks[0], (input_dim, H4), jnp.float32)
    whh0 = scale * jax.random.normal(ks[1], (hidden_dim, H4), jnp.float32)
    b0 = (scale * jax.random.normal(ks[2], (1, H4), jnp.float32)
          + scale * jax.random.normal(ks[3], (1, H4), jnp.float32))

    wih1 = scale * jax.random.normal(ks[4], (hidden_dim, H4), jnp.float32)
    whh1 = scale * jax.random.normal(ks[5], (hidden_dim, H4), jnp.float32)
    b1 = (scale * jax.random.normal(ks[6], (1, H4), jnp.float32)
          + scale * jax.random.normal(ks[7], (1, H4), jnp.float32))

    wlin = scale * jax.random.normal(ks[8], (hidden_dim, output_dim), jnp.float32)
    blin = scale * jax.random.normal(ks[9], (1, output_dim), jnp.float32)

    return (wih0, whh0, b0, wih1, whh1, b1, wlin, blin)


def reference_forward(x, params):
    """Plain-JAX reference (same math as the PyTorch module) for sanity checks."""
    wih0, whh0, b0, wih1, whh1, b1, wlin, blin = params
    H = whh0.shape[0]
    B = x.shape[1]

    def cell(x_in, h, c, wih, whh, b):
        g = x_in @ wih + h @ whh + b
        i = jax.nn.sigmoid(g[:, 0 * H:1 * H])
        f = jax.nn.sigmoid(g[:, 1 * H:2 * H])
        gg = jnp.tanh(g[:, 2 * H:3 * H])
        o = jax.nn.sigmoid(g[:, 3 * H:4 * H])
        c_new = f * c + i * gg
        return o * jnp.tanh(c_new), c_new

    def step(carry, x_t):
        h0, c0, h1, c1 = carry
        h0, c0 = cell(x_t, h0, c0, wih0, whh0, b0)
        h1, c1 = cell(h0, h1, c1, wih1, whh1, b1)
        return (h0, c0, h1, c1), h1 @ wlin + blin

    z = jnp.zeros((B, H), jnp.float32)
    _, ys = jax.lax.scan(step, (z, z, z, z), x)
    return ys


if __name__ == "__main__":
    # Small shapes consistent with the module: input.view(seq, batch, -1)
    seq_len, batch, input_dim, hidden_dim, output_dim = 8, 4, 16, 32, 1

    key = jax.random.PRNGKey(0)
    k_x, k_p = jax.random.split(key)
    x = jax.random.normal(k_x, (seq_len, batch, input_dim), jnp.float32)
    params = init_params(k_p, input_dim, hidden_dim, output_dim)

    y = ami_test_forward(x, params)
    y = jax.block_until_ready(y)

    y_ref = jax.block_until_ready(reference_forward(x, params))
    assert y.shape == (seq_len, batch, output_dim)
    assert jnp.max(jnp.abs(y - y_ref)) < 1e-4

    print("KERNEL_OK")
</pallas_src>

<mosaic_0001>
module attributes {stable_mosaic.version = 11 : i64} {
  func.func @_ami_kernel(%arg0: i32, %arg1: memref<72x16xf32, #tpu.memory_space<vmem>>, %arg2: memref<16x256xf32, #tpu.memory_space<vmem>>, %arg3: memref<1x256xf32, #tpu.memory_space<vmem>>, %arg4: memref<64x256xf32, #tpu.memory_space<vmem>>, %arg5: memref<64x128xf32, #tpu.memory_space<vmem>>, %arg6: memref<1x128xf32, #tpu.memory_space<vmem>>, %arg7: memref<64x128xf32, #tpu.memory_space<vmem>>, %arg8: memref<72x256xf32, #tpu.memory_space<vmem>>, %arg9: memref<64x64xf32, #tpu.memory_space<vmem>>) attributes {dimension_semantics = [#tpu.dimension_semantics<arbitrary>], iteration_bounds = array<i64: 1>, scalar_prefetch = 0 : i64, scratch_operands = 2 : i64, tpu.core_type = #tpu.core_type<tc>, window_params = [{pipeline_mode = #tpu.pipeline_mode<synchronous>, transform_indices = @transform_0, window_bounds = array<i64: 72, 16>}, {pipeline_mode = #tpu.pipeline_mode<synchronous>, transform_indices = @transform_1, window_bounds = array<i64: 16, 256>}, {pipeline_mode = #tpu.pipeline_mode<synchronous>, transform_indices = @transform_2, window_bounds = array<i64: 1, 256>}, {pipeline_mode = #tpu.pipeline_mode<synchronous>, transform_indices = @transform_3, window_bounds = array<i64: 64, 256>}, {pipeline_mode = #tpu.pipeline_mode<synchronous>, transform_indices = @transform_4, window_bounds = array<i64: 64, 128>}, {pipeline_mode = #tpu.pipeline_mode<synchronous>, transform_indices = @transform_5, window_bounds = array<i64: 1, 128>}, {pipeline_mode = #tpu.pipeline_mode<synchronous>, transform_indices = @transform_6, window_bounds = array<i64: 64, 128>}]} {
    %c0 = arith.constant 0 : index
    %c0_0 = arith.constant 0 : index
    %0 = vector.load %arg1[%c0, %c0_0] : memref<72x16xf32, #tpu.memory_space<vmem>>, vector<72x16xf32>
    %c0_1 = arith.constant 0 : index
    %c0_2 = arith.constant 0 : index
    %1 = vector.load %arg2[%c0_1, %c0_2] : memref<16x256xf32, #tpu.memory_space<vmem>>, vector<16x256xf32>
    %cst = arith.constant dense<0.000000e+00> : vector<72x256xf32>
    %2 = tpu.matmul %0, %1, %cst {dimension_numbers = #tpu.dot_dimension_numbers<[1], [0], [0], [1], [0, 0, 1, 1], [], []>} : vector<72x16xf32>, vector<16x256xf32>, vector<72x256xf32> -> vector<72x256xf32>
    %c0_3 = arith.constant 0 : index
    %c0_4 = arith.constant 0 : index
    %3 = vector.load %arg3[%c0_3, %c0_4] : memref<1x256xf32, #tpu.memory_space<vmem>>, vector<1x256xf32>
    %4 = vector.broadcast %3 : vector<1x256xf32> to vector<72x256xf32>
    %5 = arith.addf %2, %4 : vector<72x256xf32>
    %c0_5 = arith.constant 0 : index
    %c0_6 = arith.constant 0 : index
    %6 = vector.load %arg8[%c0_5, %c0_6] : memref<72x256xf32, #tpu.memory_space<vmem>>, vector<72x256xf32>
    tpu.vector_store %arg8[%c0_5, %c0_6], %5 {strides = array<i32>} : memref<72x256xf32, #tpu.memory_space<vmem>>, vector<72x256xf32>,
    %c0_7 = arith.constant 0 : index
    %c0_8 = arith.constant 0 : index
    %7 = vector.load %arg4[%c0_7, %c0_8] : memref<64x256xf32, #tpu.memory_space<vmem>>, vector<64x256xf32>
    %8 = tpu.iota {dimensions = array<i32: 1>} : vector<8x256xi32>
    %c128_i32 = arith.constant 128 : i32
    %9 = vector.broadcast %c128_i32 : i32 to vector<8x256xi32>
    %10 = arith.cmpi sge, %8, %9 : vector<8x256xi32>
    %c192_i32 = arith.constant 192 : i32
    %11 = vector.broadcast %c192_i32 : i32 to vector<8x256xi32>
    %12 = arith.cmpi slt, %8, %11 : vector<8x256xi32>
    %13 = arith.andi %10, %12 : vector<8x256xi1>
    %cst_9 = arith.constant 2.000000e+00 : f32
    %cst_10 = arith.constant 1.000000e+00 : f32
    %14 = vector.broadcast %cst_9 : f32 to vector<8x256xf32>
    %15 = vector.broadcast %cst_10 : f32 to vector<8x256xf32>
    %16 = arith.select %13, %14, %15 : vector<8x256xi1>, vector<8x256xf32>
    %17 = tpu.iota {dimensions = array<i32: 1>} : vector<8x64xi32>
    %c32_i32 = arith.constant 32 : i32
    %18 = vector.broadcast %c32_i32 : i32 to vector<8x64xi32>
    %19 = arith.cmpi slt, %17, %18 : vector<8x64xi32>
    %cst_11 = arith.constant 0.000000e+00 : f32
    %20 = vector.broadcast %cst_11 : f32 to vector<8x64xf32>
    %c0_12 = arith.constant 0 : index
    %c0_13 = arith.constant 0 : index
    %21 = vector.load %arg8[%c0_12, %c0_13] : memref<72x256xf32, #tpu.memory_space<vmem>>, vector<8x256xf32>
    %22 = arith.mulf %21, %16 : vector<8x256xf32>
    %23 = arith.negf %22 : vector<8x256xf32>
    %24 = math.exp %23 : vector<8x256xf32>
    %cst_14 = arith.constant 1.000000e+00 : f32
    %25 = vector.broadcast %cst_14 : f32 to vector<8x256xf32>
    %26 = arith.addf %25, %24 : vector<8x256xf32>
    %27 = arith.divf %25, %26 : vector<8x256xf32>
    %cst_15 = arith.constant 2.000000e+00 : f32
    %28 = vector.broadcast %cst_15 : f32 to vector<8x256xf32>
    %29 = arith.mulf %28, %27 : vector<8x256xf32>
    %cst_16 = arith.constant 1.000000e+00 : f32
    %30 = vector.broadcast %cst_16 : f32 to vector<8x256xf32>
    %31 = arith.subf %29, %30 : vector<8x256xf32>
    %32 = arith.select %13, %31, %27 : vector<8x256xi1>, vector<8x256xf32>
    %33 = vector.extract_strided_slice %32 {offsets = [0, 0], sizes = [8, 64], strides = [1, 1]} : vector<8x256xf32> to vector<8x64xf32>
    %34 = vector.extract_strided_slice %32 {offsets = [0, 64], sizes = [8, 64], strides = [1, 1]} : vector<8x256xf32> to vector<8x64xf32>
    %35 = vector.extract_strided_slice %32 {offsets = [0, 128], sizes = [8, 64], strides = [1, 1]} : vector<8x256xf32> to vector<8x64xf32>
    %36 = vector.extract_strided_slice %32 {offsets = [0, 192], sizes = [8, 64], strides = [1, 1]} : vector<8x256xf32> to vector<8x64xf32>
    %37 = arith.mulf %34, %20 : vector<8x64xf32>
    %38 = arith.mulf %33, %35 : vector<8x64xf32>
    %39 = arith.addf %37, %38 : vector<8x64xf32>
    %40 = math.tanh %39 : vector<8x64xf32>
    %41 = arith.mulf %36, %40 : vector<8x64xf32>
    %cst_17 = arith.constant 0.000000e+00 : f32
    %42 = vector.broadcast %cst_17 : f32 to vector<8x64xf32>
    %43 = arith.select %19, %41, %42 : vector<8x64xi1>, vector<8x64xf32>
    %cst_18 = arith.constant 0.000000e+00 : f32
    %44 = vector.broadcast %cst_18 : f32 to vector<8x64xf32>
    %45 = arith.select %19, %39, %44 : vector<8x64xi1>, vector<8x64xf32>
    %c1_i32 = arith.constant 1 : i32
    %c8_i32 = arith.constant 8 : i32
    %46 = arith.muli %c1_i32, %c8_i32 : i32
    %47 = tpu.assume_multiple %46, 8 : i32
    %c1_i32_19 = arith.constant 1 : i32
    %48 = arith.subi %c1_i32, %c1_i32_19 : i32
    %c8_i32_20 = arith.constant 8 : i32
    %49 = arith.muli %48, %c8_i32_20 : i32
    %50 = tpu.assume_multiple %49, 8 : i32
    %51 = arith.index_cast %47 : i32 to index
    %c0_21 = arith.constant 0 : index
    %52 = vector.load %arg8[%51, %c0_21] : memref<72x256xf32, #tpu.memory_space<vmem>>, vector<8x256xf32>
    %cst_22 = arith.constant dense<0.000000e+00> : vector<8x256xf32>
    %53 = tpu.matmul %43, %7, %cst_22 {dimension_numbers = #tpu.dot_dimension_numbers<[1], [0], [0], [1], [0, 0, 1, 1], [], []>} : vector<8x64xf32>, vector<64x256xf32>, vector<8x256xf32> -> vector<8x256xf32>
    %54 = arith.addf %52, %53 : vector<8x256xf32>
    %55 = arith.mulf %54, %16 : vector<8x256xf32>
    %56 = arith.negf %55 : vector<8x256xf32>
    %57 = math.exp %56 : vector<8x256xf32>
    %cst_23 = arith.constant 1.000000e+00 : f32
    %58 = vector.broadcast %cst_23 : f32 to vector<8x256xf32>
    %59 = arith.addf %58, %57 : vector<8x256xf32>
    %60 = arith.divf %58, %59 : vector<8x256xf32>
    %cst_24 = arith.constant 2.000000e+00 : f32
    %61 = vector.broadcast %cst_24 : f32 to vector<8x256xf32>
    %62 = arith.mulf %61, %60 : vector<8x256xf32>
    %cst_25 = arith.constant 1.000000e+00 : f32
    %63 = vector.broadcast %cst_25 : f32 to vector<8x256xf32>
    %64 = arith.subf %62, %63 : vector<8x256xf32>
    %65 = arith.select %13, %64, %60 : vector<8x256xi1>, vector<8x256xf32>
    %66 = vector.extract_strided_slice %65 {offsets = [0, 0], sizes = [8, 64], strides = [1, 1]} : vector<8x256xf32> to vector<8x64xf32>
    %67 = vector.extract_strided_slice %65 {offsets = [0, 64], sizes = [8, 64], strides = [1, 1]} : vector<8x256xf32> to vector<8x64xf32>
    %68 = vector.extract_strided_slice %65 {offsets = [0, 128], sizes = [8, 64], strides = [1, 1]} : vector<8x256xf32> to vector<8x64xf32>
    %69 = vector.extract_strided_slice %65 {offsets = [0, 192], sizes = [8, 64], strides = [1, 1]} : vector<8x256xf32> to vector<8x64xf32>
    %70 = arith.mulf %67, %45 : vector<8x64xf32>
    %71 = arith.mulf %66, %68 : vector<8x64xf32>
    %72 = arith.addf %70, %71 : vector<8x64xf32>
    %73 = math.tanh %72 : vector<8x64xf32>
    %74 = arith.mulf %69, %73 : vector<8x64xf32>
    %75 = arith.index_cast %50 : i32 to index
    %c0_26 = arith.constant 0 : index
    %76 = vector.load %arg9[%75, %c0_26] : memref<64x64xf32, #tpu.memory_space<vmem>>, vector<8x64xf32>
    tpu.vector_store %arg9[%75, %c0_26], %74 {strides = array<i32>} : memref<64x64xf32, #tpu.memory_space<vmem>>, vector<8x64xf32>,
    %c2_i32 = arith.constant 2 : i32
    %c8_i32_27 = arith.constant 8 : i32
    %77 = arith.muli %c2_i32, %c8_i32_27 : i32
    %78 = tpu.assume_multiple %77, 8 : i32
    %c1_i32_28 = arith.constant 1 : i32
    %79 = arith.subi %c2_i32, %c1_i32_28 : i32
    %c8_i32_29 = arith.constant 8 : i32
    %80 = arith.muli %79, %c8_i32_29 : i32
    %81 = tpu.assume_multiple %80, 8 : i32
    %82 = arith.index_cast %78 : i32 to index
    %c0_30 = arith.constant 0 : index
    %83 = vector.load %arg8[%82, %c0_30] : memref<72x256xf32, #tpu.memory_space<vmem>>, vector<8x256xf32>
    %cst_31 = arith.constant dense<0.000000e+00> : vector<8x256xf32>
    %84 = tpu.matmul %74, %7, %cst_31 {dimension_numbers = #tpu.dot_dimension_numbers<[1], [0], [0], [1], [0, 0, 1, 1], [], []>} : vector<8x64xf32>, vector<64x256xf32>, vector<8x256xf32> -> vector<8x256xf32>
    %85 = arith.addf %83, %84 : vector<8x256xf32>
    %86 = arith.mulf %85, %16 : vector<8x256xf32>
    %87 = arith.negf %86 : vector<8x256xf32>
    %88 = math.exp %87 : vector<8x256xf32>
    %cst_32 = arith.constant 1.000000e+00 : f32
    %89 = vector.broadcast %cst_32 : f32 to vector<8x256xf32>
    %90 = arith.addf %89, %88 : vector<8x256xf32>
    %91 = arith.divf %89, %90 : vector<8x256xf32>
    %cst_33 = arith.constant 2.000000e+00 : f32
    %92 = vector.broadcast %cst_33 : f32 to vector<8x256xf32>
    %93 = arith.mulf %92, %91 : vector<8x256xf32>
    %cst_34 = arith.constant 1.000000e+00 : f32
    %94 = vector.broadcast %cst_34 : f32 to vector<8x256xf32>
    %95 = arith.subf %93, %94 : vector<8x256xf32>
    %96 = arith.select %13, %95, %91 : vector<8x256xi1>, vector<8x256xf32>
    %97 = vector.extract_strided_slice %96 {offsets = [0, 0], sizes = [8, 64], strides = [1, 1]} : vector<8x256xf32> to vector<8x64xf32>
    %98 = vector.extract_strided_slice %96 {offsets = [0, 64], sizes = [8, 64], strides = [1, 1]} : vector<8x256xf32> to vector<8x64xf32>
    %99 = vector.extract_strided_slice %96 {offsets = [0, 128], sizes = [8, 64], strides = [1, 1]} : vector<8x256xf32> to vector<8x64xf32>
    %100 = vector.extract_strided_slice %96 {offsets = [0, 192], sizes = [8, 64], strides = [1, 1]} : vector<8x256xf32> to vector<8x64xf32>
    %101 = arith.mulf %98, %72 : vector<8x64xf32>
    %102 = arith.mulf %97, %99 : vector<8x64xf32>
    %103 = arith.addf %101, %102 : vector<8x64xf32>
    %104 = math.tanh %103 : vector<8x64xf32>
    %105 = arith.mulf %100, %104 : vector<8x64xf32>
    %106 = arith.index_cast %81 : i32 to index
    %c0_35 = arith.constant 0 : index
    %107 = vector.load %arg9[%106, %c0_35] : memref<64x64xf32, #tpu.memory_space<vmem>>, vector<8x64xf32>
    tpu.vector_store %arg9[%106, %c0_35], %105 {strides = array<i32>} : memref<64x64xf32, #tpu.memory_space<vmem>>, vector<8x64xf32>,
    %c3_i32 = arith.constant 3 : i32
    %c8_i32_36 = arith.constant 8 : i32
    %108 = arith.muli %c3_i32, %c8_i32_36 : i32
    %109 = tpu.assume_multiple %108, 8 : i32
    %c1_i32_37 = arith.constant 1 : i32
    %110 = arith.subi %c3_i32, %c1_i32_37 : i32
    %c8_i32_38 = arith.constant 8 : i32
    %111 = arith.muli %110, %c8_i32_38 : i32
    %112 = tpu.assume_multiple %111, 8 : i32
    %113 = arith.index_cast %109 : i32 to index
    %c0_39 = arith.constant 0 : index
    %114 = vector.load %arg8[%113, %c0_39] : memref<72x256xf32, #tpu.memory_space<vmem>>, vector<8x256xf32>
    %cst_40 = arith.constant dense<0.000000e+00> : vector<8x256xf32>
    %115 = tpu.matmul %105, %7, %cst_40 {dimension_numbers = #tpu.dot_dimension_numbers<[1], [0], [0], [1], [0, 0, 1, 1], [], []>} : vector<8x64xf32>, vector<64x256xf32>, vector<8x256xf32> -> vector<8x256xf32>
    %116 = arith.addf %114, %115 : vector<8x256xf32>
    %117 = arith.mulf %116, %16 : vector<8x256xf32>
    %118 = arith.negf %117 : vector<8x256xf32>
    %119 = math.exp %118 : vector<8x256xf32>
    %cst_41 = arith.constant 1.000000e+00 : f32
    %120 = vector.broadcast %cst_41 : f32 to vector<8x256xf32>
    %121 = arith.addf %120, %119 : vector<8x256xf32>
    %122 = arith.divf %120, %121 : vector<8x256xf32>
    %cst_42 = arith.constant 2.000000e+00 : f32
    %123 = vector.broadcast %cst_42 : f32 to vector<8x256xf32>
    %124 = arith.mulf %123, %122 : vector<8x256xf32>
    %cst_43 = arith.constant 1.000000e+00 : f32
    %125 = vector.broadcast %cst_43 : f32 to vector<8x256xf32>
    %126 = arith.subf %124, %125 : vector<8x256xf32>
    %127 = arith.select %13, %126, %122 : vector<8x256xi1>, vector<8x256xf32>
    %128 = vector.extract_strided_slice %127 {offsets = [0, 0], sizes = [8, 64], strides = [1, 1]} : vector<8x256xf32> to vector<8x64xf32>
    %129 = vector.extract_strided_slice %127 {offsets = [0, 64], sizes = [8, 64], strides = [1, 1]} : vector<8x256xf32> to vector<8x64xf32>
    %130 = vector.extract_strided_slice %127 {offsets = [0, 128], sizes = [8, 64], strides = [1, 1]} : vector<8x256xf32> to vector<8x64xf32>
    %131 = vector.extract_strided_slice %127 {offsets = [0, 192], sizes = [8, 64], strides = [1, 1]} : vector<8x256xf32> to vector<8x64xf32>
    %132 = arith.mulf %129, %103 : vector<8x64xf32>
    %133 = arith.mulf %128, %130 : vector<8x64xf32>
    %134 = arith.addf %132, %133 : vector<8x64xf32>
    %135 = math.tanh %134 : vector<8x64xf32>
    %136 = arith.mulf %131, %135 : vector<8x64xf32>
    %137 = arith.index_cast %112 : i32 to index
    %c0_44 = arith.constant 0 : index
    %138 = vector.load %arg9[%137, %c0_44] : memref<64x64xf32, #tpu.memory_space<vmem>>, vector<8x64xf32>
    tpu.vector_store %arg9[%137, %c0_44], %136 {strides = array<i32>} : memref<64x64xf32, #tpu.memory_space<vmem>>, vector<8x64xf32>,
    %c4_i32 = arith.constant 4 : i32
    %c8_i32_45 = arith.constant 8 : i32
    %139 = arith.muli %c4_i32, %c8_i32_45 : i32
    %140 = tpu.assume_multiple %139, 8 : i32
    %c1_i32_46 = arith.constant 1 : i32
    %141 = arith.subi %c4_i32, %c1_i32_46 : i32
    %c8_i32_47 = arith.constant 8 : i32
    %142 = arith.muli %141, %c8_i32_47 : i32
    %143 = tpu.assume_multiple %142, 8 : i32
    %144 = arith.index_cast %140 : i32 to index
    %c0_48 = arith.constant 0 : index
    %145 = vector.load %arg8[%144, %c0_48] : memref<72x256xf32, #tpu.memory_space<vmem>>, vector<8x256xf32>
    %cst_49 = arith.constant dense<0.000000e+00> : vector<8x256xf32>
    %146 = tpu.matmul %136, %7, %cst_49 {dimension_numbers = #tpu.dot_dimension_numbers<[1], [0], [0], [1], [0, 0, 1, 1], [], []>} : vector<8x64xf32>, vector<64x256xf32>, vector<8x256xf32> -> vector<8x256xf32>
    %147 = arith.addf %145, %146 : vector<8x256xf32>
    %148 = arith.mulf %147, %16 : vector<8x256xf32>
    %149 = arith.negf %148 : vector<8x256xf32>
    %150 = math.exp %149 : vector<8x256xf32>
    %cst_50 = arith.constant 1.000000e+00 : f32
    %151 = vector.broadcast %cst_50 : f32 to vector<8x256xf32>
    %152 = arith.addf %151, %150 : vector<8x256xf32>
    %153 = arith.divf %151, %152 : vector<8x256xf32>
    %cst_51 = arith.constant 2.000000e+00 : f32
    %154 = vector.broadcast %cst_51 : f32 to vector<8x256xf32>
    %155 = arith.mulf %154, %153 : vector<8x256xf32>
    %cst_52 = arith.constant 1.000000e+00 : f32
    %156 = vector.broadcast %cst_52 : f32 to vector<8x256xf32>
    %157 = arith.subf %155, %156 : vector<8x256xf32>
    %158 = arith.select %13, %157, %153 : vector<8x256xi1>, vector<8x256xf32>
    %159 = vector.extract_strided_slice %158 {offsets = [0, 0], sizes = [8, 64], strides = [1, 1]} : vector<8x256xf32> to vector<8x64xf32>
    %160 = vector.extract_strided_slice %158 {offsets = [0, 64], sizes = [8, 64], strides = [1, 1]} : vector<8x256xf32> to vector<8x64xf32>
    %161 = vector.extract_strided_slice %158 {offsets = [0, 128], sizes = [8, 64], strides = [1, 1]} : vector<8x256xf32> to vector<8x64xf32>
    %162 = vector.extract_strided_slice %158 {offsets = [0, 192], sizes = [8, 64], strides = [1, 1]} : vector<8x256xf32> to vector<8x64xf32>
    %163 = arith.mulf %160, %134 : vector<8x64xf32>
    %164 = arith.mulf %159, %161 : vector<8x64xf32>
    %165 = arith.addf %163, %164 : vector<8x64xf32>
    %166 = math.tanh %165 : vector<8x64xf32>
    %167 = arith.mulf %162, %166 : vector<8x64xf32>
    %168 = arith.index_cast %143 : i32 to index
    %c0_53 = arith.constant 0 : index
    %169 = vector.load %arg9[%168, %c0_53] : memref<64x64xf32, #tpu.memory_space<vmem>>, vector<8x64xf32>
    tpu.vector_store %arg9[%168, %c0_53], %167 {strides = array<i32>} : memref<64x64xf32, #tpu.memory_space<vmem>>, vector<8x64xf32>,
    %c5_i32 = arith.constant 5 : i32
    %c8_i32_54 = arith.constant 8 : i32
    %170 = arith.muli %c5_i32, %c8_i32_54 : i32
    %171 = tpu.assume_multiple %170, 8 : i32
    %c1_i32_55 = arith.constant 1 : i32
    %172 = arith.subi %c5_i32, %c1_i32_55 : i32
    %c8_i32_56 = arith.constant 8 : i32
    %173 = arith.muli %172, %c8_i32_56 : i32
    %174 = tpu.assume_multiple %173, 8 : i32
    %175 = arith.index_cast %171 : i32 to index
    %c0_57 = arith.constant 0 : index
    %176 = vector.load %arg8[%175, %c0_57] : memref<72x256xf32, #tpu.memory_space<vmem>>, vector<8x256xf32>
    %cst_58 = arith.constant dense<0.000000e+00> : vector<8x256xf32>
    %177 = tpu.matmul %167, %7, %cst_58 {dimension_numbers = #tpu.dot_dimension_numbers<[1], [0], [0], [1], [0, 0, 1, 1], [], []>} : vector<8x64xf32>, vector<64x256xf32>, vector<8x256xf32> -> vector<8x256xf32>
    %178 = arith.addf %176, %177 : vector<8x256xf32>
    %179 = arith.mulf %178, %16 : vector<8x256xf32>
    %180 = arith.negf %179 : vector<8x256xf32>
    %181 = math.exp %180 : vector<8x256xf32>
    %cst_59 = arith.constant 1.000000e+00 : f32
    %182 = vector.broadcast %cst_59 : f32 to vector<8x256xf32>
    %183 = arith.addf %182, %181 : vector<8x256xf32>
    %184 = arith.divf %182, %183 : vector<8x256xf32>
    %cst_60 = arith.constant 2.000000e+00 : f32
    %185 = vector.broadcast %cst_60 : f32 to vector<8x256xf32>
    %186 = arith.mulf %185, %184 : vector<8x256xf32>
    %cst_61 = arith.constant 1.000000e+00 : f32
    %187 = vector.broadcast %cst_61 : f32 to vector<8x256xf32>
    %188 = arith.subf %186, %187 : vector<8x256xf32>
    %189 = arith.select %13, %188, %184 : vector<8x256xi1>, vector<8x256xf32>
    %190 = vector.extract_strided_slice %189 {offsets = [0, 0], sizes = [8, 64], strides = [1, 1]} : vector<8x256xf32> to vector<8x64xf32>
    %191 = vector.extract_strided_slice %189 {offsets = [0, 64], sizes = [8, 64], strides = [1, 1]} : vector<8x256xf32> to vector<8x64xf32>
    %192 = vector.extract_strided_slice %189 {offsets = [0, 128], sizes = [8, 64], strides = [1, 1]} : vector<8x256xf32> to vector<8x64xf32>
    %193 = vector.extract_strided_slice %189 {offsets = [0, 192], sizes = [8, 64], strides = [1, 1]} : vector<8x256xf32> to vector<8x64xf32>
    %194 = arith.mulf %191, %165 : vector<8x64xf32>
    %195 = arith.mulf %190, %192 : vector<8x64xf32>
    %196 = arith.addf %194, %195 : vector<8x64xf32>
    %197 = math.tanh %196 : vector<8x64xf32>
    %198 = arith.mulf %193, %197 : vector<8x64xf32>
    %199 = arith.index_cast %174 : i32 to index
    %c0_62 = arith.constant 0 : index
    %200 = vector.load %arg9[%199, %c0_62] : memref<64x64xf32, #tpu.memory_space<vmem>>, vector<8x64xf32>
    tpu.vector_store %arg9[%199, %c0_62], %198 {strides = array<i32>} : memref<64x64xf32, #tpu.memory_space<vmem>>, vector<8x64xf32>,
    %c6_i32 = arith.constant 6 : i32
    %c8_i32_63 = arith.constant 8 : i32
    %201 = arith.muli %c6_i32, %c8_i32_63 : i32
    %202 = tpu.assume_multiple %201, 8 : i32
    %c1_i32_64 = arith.constant 1 : i32
    %203 = arith.subi %c6_i32, %c1_i32_64 : i32
    %c8_i32_65 = arith.constant 8 : i32
    %204 = arith.muli %203, %c8_i32_65 : i32
    %205 = tpu.assume_multiple %204, 8 : i32
    %206 = arith.index_cast %202 : i32 to index
    %c0_66 = arith.constant 0 : index
    %207 = vector.load %arg8[%206, %c0_66] : memref<72x256xf32, #tpu.memory_space<vmem>>, vector<8x256xf32>
    %cst_67 = arith.constant dense<0.000000e+00> : vector<8x256xf32>
    %208 = tpu.matmul %198, %7, %cst_67 {dimension_numbers = #tpu.dot_dimension_numbers<[1], [0], [0], [1], [0, 0, 1, 1], [], []>} : vector<8x64xf32>, vector<64x256xf32>, vector<8x256xf32> -> vector<8x256xf32>
    %209 = arith.addf %207, %208 : vector<8x256xf32>
    %210 = arith.mulf %209, %16 : vector<8x256xf32>
    %211 = arith.negf %210 : vector<8x256xf32>
    %212 = math.exp %211 : vector<8x256xf32>
    %cst_68 = arith.constant 1.000000e+00 : f32
    %213 = vector.broadcast %cst_68 : f32 to vector<8x256xf32>
    %214 = arith.addf %213, %212 : vector<8x256xf32>
    %215 = arith.divf %213, %214 : vector<8x256xf32>
    %cst_69 = arith.constant 2.000000e+00 : f32
    %216 = vector.broadcast %cst_69 : f32 to vector<8x256xf32>
    %217 = arith.mulf %216, %215 : vector<8x256xf32>
    %cst_70 = arith.constant 1.000000e+00 : f32
    %218 = vector.broadcast %cst_70 : f32 to vector<8x256xf32>
    %219 = arith.subf %217, %218 : vector<8x256xf32>
    %220 = arith.select %13, %219, %215 : vector<8x256xi1>, vector<8x256xf32>
    %221 = vector.extract_strided_slice %220 {offsets = [0, 0], sizes = [8, 64], strides = [1, 1]} : vector<8x256xf32> to vector<8x64xf32>
    %222 = vector.extract_strided_slice %220 {offsets = [0, 64], sizes = [8, 64], strides = [1, 1]} : vector<8x256xf32> to vector<8x64xf32>
    %223 = vector.extract_strided_slice %220 {offsets = [0, 128], sizes = [8, 64], strides = [1, 1]} : vector<8x256xf32> to vector<8x64xf32>
    %224 = vector.extract_strided_slice %220 {offsets = [0, 192], sizes = [8, 64], strides = [1, 1]} : vector<8x256xf32> to vector<8x64xf32>
    %225 = arith.mulf %222, %196 : vector<8x64xf32>
    %226 = arith.mulf %221, %223 : vector<8x64xf32>
    %227 = arith.addf %225, %226 : vector<8x64xf32>
    %228 = math.tanh %227 : vector<8x64xf32>
    %229 = arith.mulf %224, %228 : vector<8x64xf32>
    %230 = arith.index_cast %205 : i32 to index
    %c0_71 = arith.constant 0 : index
    %231 = vector.load %arg9[%230, %c0_71] : memref<64x64xf32, #tpu.memory_space<vmem>>, vector<8x64xf32>
    tpu.vector_store %arg9[%230, %c0_71], %229 {strides = array<i32>} : memref<64x64xf32, #tpu.memory_space<vmem>>, vector<8x64xf32>,
    %c7_i32 = arith.constant 7 : i32
    %c8_i32_72 = arith.constant 8 : i32
    %232 = arith.muli %c7_i32, %c8_i32_72 : i32
    %233 = tpu.assume_multiple %232, 8 : i32
    %c1_i32_73 = arith.constant 1 : i32
    %234 = arith.subi %c7_i32, %c1_i32_73 : i32
    %c8_i32_74 = arith.constant 8 : i32
    %235 = arith.muli %234, %c8_i32_74 : i32
    %236 = tpu.assume_multiple %235, 8 : i32
    %237 = arith.index_cast %233 : i32 to index
    %c0_75 = arith.constant 0 : index
    %238 = vector.load %arg8[%237, %c0_75] : memref<72x256xf32, #tpu.memory_space<vmem>>, vector<8x256xf32>
    %cst_76 = arith.constant dense<0.000000e+00> : vector<8x256xf32>
    %239 = tpu.matmul %229, %7, %cst_76 {dimension_numbers = #tpu.dot_dimension_numbers<[1], [0], [0], [1], [0, 0, 1, 1], [], []>} : vector<8x64xf32>, vector<64x256xf32>, vector<8x256xf32> -> vector<8x256xf32>
    %240 = arith.addf %238, %239 : vector<8x256xf32>
    %241 = arith.mulf %240, %16 : vector<8x256xf32>
    %242 = arith.negf %241 : vector<8x256xf32>
    %243 = math.exp %242 : vector<8x256xf32>
    %cst_77 = arith.constant 1.000000e+00 : f32
    %244 = vector.broadcast %cst_77 : f32 to vector<8x256xf32>
    %245 = arith.addf %244, %243 : vector<8x256xf32>
    %246 = arith.divf %244, %245 : vector<8x256xf32>
    %cst_78 = arith.constant 2.000000e+00 : f32
    %247 = vector.broadcast %cst_78 : f32 to vector<8x256xf32>
    %248 = arith.mulf %247, %246 : vector<8x256xf32>
    %cst_79 = arith.constant 1.000000e+00 : f32
    %249 = vector.broadcast %cst_79 : f32 to vector<8x256xf32>
    %250 = arith.subf %248, %249 : vector<8x256xf32>
    %251 = arith.select %13, %250, %246 : vector<8x256xi1>, vector<8x256xf32>
    %252 = vector.extract_strided_slice %251 {offsets = [0, 0], sizes = [8, 64], strides = [1, 1]} : vector<8x256xf32> to vector<8x64xf32>
    %253 = vector.extract_strided_slice %251 {offsets = [0, 64], sizes = [8, 64], strides = [1, 1]} : vector<8x256xf32> to vector<8x64xf32>
    %254 = vector.extract_strided_slice %251 {offsets = [0, 128], sizes = [8, 64], strides = [1, 1]} : vector<8x256xf32> to vector<8x64xf32>
    %255 = vector.extract_strided_slice %251 {offsets = [0, 192], sizes = [8, 64], strides = [1, 1]} : vector<8x256xf32> to vector<8x64xf32>
    %256 = arith.mulf %253, %227 : vector<8x64xf32>
    %257 = arith.mulf %252, %254 : vector<8x64xf32>
    %258 = arith.addf %256, %257 : vector<8x64xf32>
    %259 = math.tanh %258 : vector<8x64xf32>
    %260 = arith.mulf %255, %259 : vector<8x64xf32>
    %261 = arith.index_cast %236 : i32 to index
    %c0_80 = arith.constant 0 : index
    %262 = vector.load %arg9[%261, %c0_80] : memref<64x64xf32, #tpu.memory_space<vmem>>, vector<8x64xf32>
    tpu.vector_store %arg9[%261, %c0_80], %260 {strides = array<i32>} : memref<64x64xf32, #tpu.memory_space<vmem>>, vector<8x64xf32>,
    %c8_i32_81 = arith.constant 8 : i32
    %c8_i32_82 = arith.constant 8 : i32
    %263 = arith.muli %c8_i32_81, %c8_i32_82 : i32
    %264 = tpu.assume_multiple %263, 8 : i32
    %c1_i32_83 = arith.constant 1 : i32
    %265 = arith.subi %c8_i32_81, %c1_i32_83 : i32
    %c8_i32_84 = arith.constant 8 : i32
    %266 = arith.muli %265, %c8_i32_84 : i32
    %267 = tpu.assume_multiple %266, 8 : i32
    %268 = arith.index_cast %264 : i32 to index
    %c0_85 = arith.constant 0 : index
    %269 = vector.load %arg8[%268, %c0_85] : memref<72x256xf32, #tpu.memory_space<vmem>>, vector<8x256xf32>
    %cst_86 = arith.constant dense<0.000000e+00> : vector<8x256xf32>
    %270 = tpu.matmul %260, %7, %cst_86 {dimension_numbers = #tpu.dot_dimension_numbers<[1], [0], [0], [1], [0, 0, 1, 1], [], []>} : vector<8x64xf32>, vector<64x256xf32>, vector<8x256xf32> -> vector<8x256xf32>
    %271 = arith.addf %269, %270 : vector<8x256xf32>
    %272 = arith.mulf %271, %16 : vector<8x256xf32>
    %273 = arith.negf %272 : vector<8x256xf32>
    %274 = math.exp %273 : vector<8x256xf32>
    %cst_87 = arith.constant 1.000000e+00 : f32
    %275 = vector.broadcast %cst_87 : f32 to vector<8x256xf32>
    %276 = arith.addf %275, %274 : vector<8x256xf32>
    %277 = arith.divf %275, %276 : vector<8x256xf32>
    %cst_88 = arith.constant 2.000000e+00 : f32
    %278 = vector.broadcast %cst_88 : f32 to vector<8x256xf32>
    %279 = arith.mulf %278, %277 : vector<8x256xf32>
    %cst_89 = arith.constant 1.000000e+00 : f32
    %280 = vector.broadcast %cst_89 : f32 to vector<8x256xf32>
    %281 = arith.subf %279, %280 : vector<8x256xf32>
    %282 = arith.select %13, %281, %277 : vector<8x256xi1>, vector<8x256xf32>
    %283 = vector.extract_strided_slice %282 {offsets = [0, 0], sizes = [8, 64], strides = [1, 1]} : vector<8x256xf32> to vector<8x64xf32>
    %284 = vector.extract_strided_slice %282 {offsets = [0, 64], sizes = [8, 64], strides = [1, 1]} : vector<8x256xf32> to vector<8x64xf32>
    %285 = vector.extract_strided_slice %282 {offsets = [0, 128], sizes = [8, 64], strides = [1, 1]} : vector<8x256xf32> to vector<8x64xf32>
    %286 = vector.extract_strided_slice %282 {offsets = [0, 192], sizes = [8, 64], strides = [1, 1]} : vector<8x256xf32> to vector<8x64xf32>
    %287 = arith.mulf %284, %258 : vector<8x64xf32>
    %288 = arith.mulf %283, %285 : vector<8x64xf32>
    %289 = arith.addf %287, %288 : vector<8x64xf32>
    %290 = math.tanh %289 : vector<8x64xf32>
    %291 = arith.mulf %286, %290 : vector<8x64xf32>
    %292 = arith.index_cast %267 : i32 to index
    %c0_90 = arith.constant 0 : index
    %293 = vector.load %arg9[%292, %c0_90] : memref<64x64xf32, #tpu.memory_space<vmem>>, vector<8x64xf32>
    tpu.vector_store %arg9[%292, %c0_90], %291 {strides = array<i32>} : memref<64x64xf32, #tpu.memory_space<vmem>>, vector<8x64xf32>,
    %c8_i32_91 = arith.constant 8 : i32
    %c0_92 = arith.constant 0 : index
    %c0_93 = arith.constant 0 : index
    %294 = vector.load %arg9[%c0_92, %c0_93] : memref<64x64xf32, #tpu.memory_space<vmem>>, vector<64x64xf32>
    %c0_94 = arith.constant 0 : index
    %c0_95 = arith.constant 0 : index
    %295 = vector.load %arg5[%c0_94, %c0_95] : memref<64x128xf32, #tpu.memory_space<vmem>>, vector<64x128xf32>
    %cst_96 = arith.constant dense<0.000000e+00> : vector<64x128xf32>
    %296 = tpu.matmul %294, %295, %cst_96 {dimension_numbers = #tpu.dot_dimension_numbers<[1], [0], [0], [1], [0, 0, 1, 1], [], []>} : vector<64x64xf32>, vector<64x128xf32>, vector<64x128xf32> -> vector<64x128xf32>
    %c0_97 = arith.constant 0 : index
    %c0_98 = arith.constant 0 : index
    %297 = vector.load %arg6[%c0_97, %c0_98] : memref<1x128xf32, #tpu.memory_space<vmem>>, vector<1x128xf32>
    %298 = vector.broadcast %297 : vector<1x128xf32> to vector<64x128xf32>
    %299 = arith.addf %296, %298 : vector<64x128xf32>
    %c0_99 = arith.constant 0 : index
    %c0_100 = arith.constant 0 : index
    %300 = vector.load %arg7[%c0_99, %c0_100] : memref<64x128xf32, #tpu.memory_space<vmem>>, vector<64x128xf32>
    tpu.vector_store %arg7[%c0_99, %c0_100], %299 {strides = array<i32>} : memref<64x128xf32, #tpu.memory_space<vmem>>, vector<64x128xf32>,
    return
  }
  func.func @transform_0(%arg0: i32) -> (i32, i32) {
    %c0_i32 = arith.constant 0 : i32
    %c0_i32_0 = arith.constant 0 : i32
    %c0_i32_1 = arith.constant 0 : i32
    return %c0_i32, %c0_i32_0 : i32, i32
  }
  func.func @transform_1(%arg0: i32) -> (i32, i32) {
    %c0_i32 = arith.constant 0 : i32
    %c0_i32_0 = arith.constant 0 : i32
    %c0_i32_1 = arith.constant 0 : i32
    return %c0_i32, %c0_i32_0 : i32, i32
  }
  func.func @transform_2(%arg0: i32) -> (i32, i32) {
    %c0_i32 = arith.constant 0 : i32
    %c0_i32_0 = arith.constant 0 : i32
    %c0_i32_1 = arith.constant 0 : i32
    return %c0_i32, %c0_i32_0 : i32, i32
  }
  func.func @transform_3(%arg0: i32) -> (i32, i32) {
    %c0_i32 = arith.constant 0 : i32
    %c0_i32_0 = arith.constant 0 : i32
    %c0_i32_1 = arith.constant 0 : i32
    return %c0_i32, %c0_i32_0 : i32, i32
  }
  func.func @transform_4(%arg0: i32) -> (i32, i32) {
    %c0_i32 = arith.constant 0 : i32
    %c0_i32_0 = arith.constant 0 : i32
    %c0_i32_1 = arith.constant 0 : i32
    return %c0_i32, %c0_i32_0 : i32, i32
  }
  func.func @transform_5(%arg0: i32) -> (i32, i32) {
    %c0_i32 = arith.constant 0 : i32
    %c0_i32_0 = arith.constant 0 : i32
    %c0_i32_1 = arith.constant 0 : i32
    return %c0_i32, %c0_i32_0 : i32, i32
  }
  func.func @transform_6(%arg0: i32) -> (i32, i32) {
    %c0_i32 = arith.constant 0 : i32
    %c0_i32_0 = arith.constant 0 : i32
    %c0_i32_1 = arith.constant 0 : i32
    return %c0_i32, %c0_i32_0 : i32, i32
  }
}

</mosaic_0001>

<bundles_post_ra>
// kernel: tpu_custom_call.1
= control target key start
LH: loop header
LB: loop body
LE: loop exit
PB: predicated region body
PF: predicated region fallthrough
CT: control target
= control target key end

     0   :  { %11 = vsyncpa [#allocation5], 0  ;;  %s2241_s0 = inlined_call_operand.vmem [shape: f32[72,16], index: 0, kind: input, shape index: {}]   ;;  %s2242_s1 = inlined_call_operand.vmem [shape: f32[16,256], index: 1, kind: input, shape index: {}]   ;;  %s2243_s2 = inlined_call_operand.vmem [shape: f32[1,256], index: 2, kind: input, shape index: {}]   ;;  %s2244_s3 = inlined_call_operand.hbm [shape: f32[64,256], index: 3, kind: input, shape index: {}]   ;;  %s2245_s4 = inlined_call_operand.vmem [shape: f32[64,128], index: 4, kind: input, shape index: {}]   ;;  %s2246_s5 = inlined_call_operand.vmem [shape: f32[1,128], index: 5, kind: input, shape index: {}]   ;;  %s2247_s6 = inlined_call_operand.hbm [shape: f32[64,128], index: 6, kind: output, shape index: {}]  }
   0x1   :  { %12 = vsyncpa [#allocation6], 0  ;;  %s1840_s21 = smov [#allocation4]   ;;  %s1792_s25 = scalar_lea.hbm %s2244_s3, 2048 }
   0x2   :  { %s24_s22 = sshll.u32 %s1840_s21, 4  ;;  %p1793_p0 = scmp.ne.s32.totalorder %s2244_s3, %s1792_s25  ;;  %s25_s22 = int_to_ptr.vmem [resolvable:$true] %s24_s22 }
   0x3   :  { %p1796_p1 = scmp.lt.u32.totalorder %s1792_s25, %s2244_s3 }
   0x5   :  { %p1798_p2 = pnand %p1796_p1, %p1793_p0 }
   0x7   :  { %1801 = shalt.err (!%p1798_p2)
}
   0x8   :  { %s1802_s30 = scalar_lea.vmem %s25_s22, 2048  ;;  %p1807_p4 = scmp.lt.s32.totalorder %s25_s22, %s25_s22 }
   0x9   :  { %p1803_p3 = scmp.ne.s32.totalorder %s25_s22, %s1802_s30  ;;  %p1808_p5 = scmp.lt.s32.totalorder %s1802_s30, %s1802_s30 }
   0xb   :  { %p1809_p6 = por %p1808_p5, %p1807_p4 }
   0xd   :  { %p1810_p7 = pnand %p1809_p6, %p1803_p3 }
   0xf   :  { %1813 = shalt.err (!%p1810_p7)
}
  0x10   :  { %s1841_s7 = smov 256   ;;  %s1842_s8 = smov 16  }
  0x11   :  { %30 = dma.hbm_to_vmem [thread:$0]  %s2244_s3, 2048, %s25_s22, [#allocation5], %s1841_s7, %s1841_s7, %s1842_s8  }
  0x12   :  { %1836 = dma.done.wait [#allocation5], 2048  }
  0x13   :  { %1837 = vsyncadd [#allocation5], 4294965248  ;;  %v1843_v0 = vmov 0.0   ;;  %v48_v1 = vld [vmem:[%s2242_s1 + $0x8] sm:$0xff]  ;;  %v50_v2 = vld [vmem:[%s2242_s1 + $0x18] sm:$0xff]  ;;  %vm63_vm0 = vcmask 130048   ;;  %v53_v8 = vlaneseq }
  0x14   :  { %155 = vmatprep.mubr.f32.mxu1 %v1843_v0  ;;  %603 = vmatprep.mubr.f32.mxu0 %v1843_v0  ;;  %v47_v3 = vld [vmem:[%s2242_s1] sm:$0xff]  ;;  %v1513_v4 = vpack.c.bf16 %v50_v2, %v48_v1  ;;  %v49_v5 = vld [vmem:[%s2242_s1 + $0x10] sm:$0xff]  ;;  %v1844_v20 = vmov 1.0   ;;  %s1845_s1 = smov 64   ;;  %v229_v36 = vld [vmem:[#allocation4 + $0x8] sm:$0xff]  ;;  %vm302_vm3 = vcmask 523264  }
  0x15   :  { %v1515_v6 = vpack.c.bf16 %v49_v5, %v47_v3  ;;  %v38_v7 = vld [vmem:[%s2241_s0] sm:$0xff]  ;;  %v54_v9 = vshrl.u32 %v53_v8, 7  ;;  %v1915_v10 = vand.u32 127, %v53_v8  ;;  %v231_v37 = vld [vmem:[#allocation4 + $0x18] sm:$0xff]  ;;  %v230_v40 = vld [vmem:[#allocation4 + $0x10] sm:$0xff] }
  0x16   :  { %1514 = vmatprep.subr.bf16.mxu1 %v1513_v4  ;;  %v51_v12 = vld [vmem:[%s2243_s2] sm:$0x3]  ;;  %v1944_v39 = vpack.c.bf16 %v231_v37, %v229_v36  ;;  %v39_v41 = vld [vmem:[%s2241_s0 + $0x8] sm:$0xff]  ;;  %v235_v44 = vld [vmem:[#allocation4 + $0x38] sm:$0xff] }
  0x17   :  { %1516 = vmatpush1.bf16.msra.mxu1 %v1515_v6  ;;  %v55_v11 = vsub.s32 0, %v54_v9  ;;  %v59_v13 = vsub.s32 1, %v54_v9  ;;  %v1921_v14 = vadd.s32 128, %v1915_v10  ;;  %v228_v38 = vld [vmem:[#allocation4] sm:$0xff]  ;;  %v233_v43 = vld [vmem:[#allocation4 + $0x28] sm:$0xff]  ;;  %v40_v46 = vld [vmem:[%s2241_s0 + $0x10] sm:$0xff] }
  0x18   :  { %v1949_v42 = vpack.c.bf16 %v230_v40, %v228_v38  ;;  %v232_v45 = vld [vmem:[#allocation4 + $0x20] sm:$0xff]  ;;  %1518 = vmatprep.subr.bf16.mxu1 %v1944_v39  ;;  %v1957_v47 = vpack.c.bf16 %v235_v44, %v233_v43  ;;  %v234_v48 = vld [vmem:[#allocation4 + $0x30] sm:$0xff]  ;;  %v237_v50 = vld [vmem:[#allocation4 + $0x48] sm:$0xff]  ;;  %1550 = vmatprep.subr.bf16.mxu0 %v1944_v39  ;;  %vm255_vm2 = vcmp.lt.s32.totalorder %v1915_v10, 32 }
  0x19   :  { %v1923_v15 = vrot.slane %v51_v12, %v55_v11  ;;  %v1925_v16 = vrot.slane %v51_v12, %v59_v13  ;;  %vm250_vm1 = vcmp.lt.s32.totalorder %v1921_v14, 192  ;;  %v1960_v49 = vpack.c.bf16 %v234_v48, %v232_v45  ;;  %v239_v51 = vld [vmem:[#allocation4 + $0x58] sm:$0xff]  ;;  %v236_v53 = vld [vmem:[#allocation4 + $0x40] sm:$0xff]  ;;  %v238_v54 = vld [vmem:[#allocation4 + $0x50] sm:$0xff] }
  0x1a   :  { %1407 = vmatmul.mubr.msk.f32.vlgmr.msra.gmra.mrb[0].mxu1 %vm63_vm0, %v38_v7  ;;  %v1931_v21 = vsel %vm250_vm1, 2.0, %v1844_v20  ;;  %v1964_v52 = vpack.c.bf16 %v239_v51, %v237_v50  ;;  %1552 = vmatpush1.bf16.msra.mxu0 %v1949_v42  ;;  %v41_v55 = vld [vmem:[%s2241_s0 + $0x18] sm:$0xff]  ;;  %v1974_v56 = vpack.c.bf16 %v238_v54, %v236_v53  ;;  %v42_v57 = vld [vmem:[%s2241_s0 + $0x20] sm:$0xff]  ;;  %v43_v58 = vld [vmem:[%s2241_s0 + $0x28] sm:$0xff] }
  0x1b   :  { %161 = vmatprep.mubr.f32.mxu1 %v1843_v0  ;;  %1520 = vmatpush1.bf16.msra.mxu1 %v1949_v42  ;;  %v44_v59 = vld [vmem:[%s2241_s0 + $0x30] sm:$0xff]  ;;  %v241_v60 = vld [vmem:[#allocation4 + $0x68] sm:$0xff]  ;;  %v243_v61 = vld [vmem:[#allocation4 + $0x78] sm:$0xff] }
  0x1c   :  { %1522 = vmatprep.subr.bf16.mxu1 %v1957_v47  ;;  %1554 = vmatprep.subr.bf16.mxu0 %v1957_v47  ;;  %v1998_v62 = vpack.c.bf16 %v243_v61, %v241_v60  ;;  %v45_v63 = vld [vmem:[%s2241_s0 + $0x38] sm:$0xff]  ;;  %v240_v1 = vld [vmem:[#allocation4 + $0x60] sm:$0xff]  ;;  %v242_v2 = vld [vmem:[#allocation4 + $0x70] sm:$0xff] }
  0x1d   :  { %v2003_v3 = vpack.c.bf16 %v242_v2, %v240_v1  ;;  %v46_v4 = vld [vmem:[%s2241_s0 + $0x40] sm:$0xff] }
  0x1e   :  { %1408 = vmatmul.mubr.msk.f32.gmra.mrb[2].mxu1 %vm63_vm0, %v39_v41  ;;  %1556 = vmatpush1.bf16.msra.mxu0 %v1960_v49 }
  0x1f   :  { %167 = vmatprep.mubr.f32.mxu1 %v1843_v0  ;;  %1524 = vmatpush1.bf16.msra.mxu1 %v1960_v49 }
  0x20   :  { %1526 = vmatprep.subr.bf16.mxu1 %v1964_v52  ;;  %1558 = vmatprep.subr.bf16.mxu0 %v1964_v52 }
  0x22   :  { %1409 = vmatmul.mubr.msk.f32.gmra.mrb[4].mxu1 %vm63_vm0, %v40_v46  ;;  %1560 = vmatpush1.bf16.msra.mxu0 %v1974_v56 }
  0x23   :  { %173 = vmatprep.mubr.f32.mxu1 %v1843_v0  ;;  %1528 = vmatpush1.bf16.msra.mxu1 %v1974_v56 }
  0x24   :  { %1530 = vmatprep.subr.bf16.mxu1 %v1998_v62  ;;  %1562 = vmatprep.subr.bf16.mxu0 %v1998_v62 }
  0x26   :  { %1410 = vmatmul.mubr.msk.f32.gmra.mrb[6].mxu1 %vm63_vm0, %v41_v55  ;;  %1564 = vmatpush1.bf16.msra.mxu0 %v2003_v3 }
  0x27   :  { %179 = vmatprep.mubr.f32.mxu1 %v1843_v0  ;;  %1532 = vmatpush1.bf16.msra.mxu1 %v2003_v3 }
  0x28   :  { %1534 = vmatprep.subr.bf16.mxu1 %v1944_v39  ;;  %1566 = vmatprep.subr.bf16.mxu0 %v1944_v39 }
  0x2a   :  { %1411 = vmatmul.mubr.msk.f32.gmra.mrb[8].mxu1 %vm63_vm0, %v42_v57 }
  0x2b   :  { %185 = vmatprep.mubr.f32.mxu1 %v1843_v0 }
  0x2e   :  { %1412 = vmatmul.mubr.msk.f32.gmra.mrb[10].mxu1 %vm63_vm0, %v43_v58 }
  0x2f   :  { %191 = vmatprep.mubr.f32.mxu1 %v1843_v0 }
  0x32   :  { %1413 = vmatmul.mubr.msk.f32.gmra.mrb[12].mxu1 %vm63_vm0, %v44_v59 }
  0x33   :  { %197 = vmatprep.mubr.f32.mxu1 %v1843_v0 }
  0x36   :  { %1414 = vmatmul.mubr.msk.f32.gmra.mrb[14].mxu1 %vm63_vm0, %v45_v63 }
  0x37   :  { %203 = vmatprep.mubr.f32.mxu1 %v1843_v0 }
  0x3a   :  { %1415 = vmatmul.mubr.msk.f32.gmra.mrb[16].mxu1 %vm63_vm0, %v46_v4 }
  0x3b   :  { %370 = vmatprep.mubr.f32.mxu1 %v1843_v0 }
  0xed   :  { %v157_v17 = vpop.f32.mrb[0].mxu1 }
  0xee   :  { %v158_v18 = vadd.f32 %v157_v17, %v1923_v15  ;;  %v159_v19 = vpop.f32.mrb[1].mxu1 }
  0xef   :  { %v160_v22 = vadd.f32 %v159_v19, %v1925_v16 }
  0xf0   :  { %v1416_v24 = vmul.f32 -1.442695, %v158_v18 }
  0xf1   :  { %v259_v23 = vmul.f32 %v1931_v21, %v160_v22 }
  0xf3   :  { %v1417_v25 = vmul.f32 -1.442695, %v259_v23 }
  0xf5   :  { %1702 = vpow2.f32 %v1417_v25 }
  0xf6   :  { %1704 = vpow2.f32 %v1416_v24 }
  0xf9   :  { %v2022_v11 = vpop.f32.mrb[6].mxu1 }
  0xfa   :  { %v2024_v12 = vpop.f32.mrb[7].mxu1 }
  0xfd   :  { %v2026_v13 = vpop.f32.mrb[8].mxu1 }
  0xfe   :  { %v2028_v17 = vpop.f32.mrb[9].mxu1 }
  0xff   :  { %v1703_v26 = vpop.eup %1702 }
 0x100   :  { %v1705_v27 = vpop.eup %1704  ;;  %v267_v28 = vadd.f32 1.0, %v1703_v26 }
 0x101   :  { %v266_v29 = vadd.f32 1.0, %v1705_v27  ;;  %v2031_v19 = vpop.f32.mrb[10].mxu1 }
 0x102   :  { %1706 = vrcp.f32 %v267_v28  ;;  %v2033_v22 = vpop.f32.mrb[11].mxu1 }
 0x103   :  { %1708 = vrcp.f32 %v266_v29 }
 0x105   :  { %v2045_v10 = vpop.f32.mrb[12].mxu1 }
 0x106   :  { %v2047_v25 = vpop.f32.mrb[13].mxu1 }
 0x109   :  { %v2049_v26 = vpop.f32.mrb[14].mxu1 }
 0x10a   :  { %v2051_v27 = vpop.f32.mrb[15].mxu1 }
 0x10c   :  { %v1707_v30 = vpop.eup %1706 }
 0x10d   :  { %v273_v31 = vmul.f32 2.0, %v1707_v30  ;;  %v1935_v33 = vpop.eup %1708  ;;  %v2053_v28 = vpop.f32.mrb[16].mxu1 }
 0x10e   :  { %v278_v5 = vmul.f32 0.0, %v1935_v33  ;;  %v2055_v29 = vpop.f32.mrb[17].mxu1 }
 0x10f   :  { %v1419_v32 = vadd.f32 -1.0, %v273_v31 }
 0x111   :  { %v1939_v34 = vsel %vm250_vm1, %v1419_v32, %v1707_v30 }
 0x112   :  { %v279_v35 = vmul.f32 %v1935_v33, %v1939_v34 }
 0x114   :  { %281 = vrot.lane.b32.xlu0 %v279_v35, %s1845_s1 }
 0x186   :  { %v282_v6 = vpop.permute.xlu0 %281 }
 0x187   :  { %v284_v7 = vadd.f32 %v282_v6, %v278_v5 }
 0x189   :  { %1710 = vtanh.f32 %v284_v7  ;;  %293 = vrot.lane.b32.xlu1 %v284_v7, %s1845_s1 }
 0x193   :  { %v1711_v8 = vpop.eup %1710 }
 0x194   :  { %v286_v9 = vmul.f32 %v1711_v8, %v1939_v34 }
 0x196   :  { %288 = vrot.lane.b32.xlu0 %v286_v9, %s1845_s1 }
 0x1fb   :  { %v294_v18 = vpop.permute.xlu1 %293 }
 0x1fc   :  { %v296_v20 = vsel %vm255_vm2, %v294_v18, 0.0 }
 0x1fd   :  { %400 = vrot.lane.b32.xlu1 %v296_v20, %s1845_s1 }
 0x208   :  { %v289_v23 = vpop.permute.xlu0 %288 }
 0x209   :  { %v291_v24 = vsel %vm255_vm2, %v289_v23, 0.0 }
 0x20a   :  { %1420 = vmatmul.mubr.msk.f32.vlgmr.msra.gmra.mrb[2].mxu1 %vm302_vm3, %v291_v24 }
 0x20b   :  { %1536 = vmatpush1.bf16.msra.mxu1 %v1949_v42  ;;  %488 = vmatprep.mubr.f32.mxu1 %v1843_v0 }
 0x20c   :  { %1538 = vmatprep.subr.bf16.mxu1 %v1957_v47 }
 0x20f   :  { %1540 = vmatpush1.bf16.msra.mxu1 %v1960_v49 }
 0x210   :  { %1542 = vmatprep.subr.bf16.mxu1 %v1964_v52 }
 0x213   :  { %1544 = vmatpush1.bf16.msra.mxu1 %v1974_v56 }
 0x214   :  { %1546 = vmatprep.subr.bf16.mxu1 %v1998_v62 }
 0x217   :  { %1548 = vmatpush1.bf16.msra.mxu1 %v2003_v3 }
 0x26f   :  { %v401_v51 = vpop.permute.xlu1 %400 }
 0x2dd   :  { %v372_v30 = vpop.f32.mrb[2].mxu1 }
 0x2de   :  { %v1661_v31 = vadd.f32 %v372_v30, %v1923_v15  ;;  %v374_v32 = vpop.f32.mrb[3].mxu1 }
 0x2df   :  { %v1662_v33 = vadd.f32 %v374_v32, %v1925_v16 }
 0x2e0   :  { %v1421_v35 = vmul.f32 -1.442695, %v1661_v31 }
 0x2e1   :  { %v380_v34 = vmul.f32 %v1662_v33, %v1931_v21  ;;  %v1230_v33 = vld [vmem:[%s2245_s4] sm:$0xff] }
 0x2e3   :  { %v1422_v36 = vmul.f32 -1.442695, %v380_v34  ;;  %v1231_v34 = vld [vmem:[%s2245_s4 + $0x8] sm:$0xff] }
 0x2e5   :  { %1712 = vpow2.f32 %v1422_v36  ;;  %v1645_v36 = vpack.c.bf16 %v1231_v34, %v1230_v33 }
 0x2e6   :  { %1714 = vpow2.f32 %v1421_v35  ;;  %v1232_v35 = vld [vmem:[%s2245_s4 + $0x10] sm:$0xff] }
 0x2e7   :  { %1646 = vmatprep.subr.bf16.mxu1 %v1645_v36 }
 0x2ef   :  { %v1713_v37 = vpop.eup %1712 }
 0x2f0   :  { %v1715_v38 = vpop.eup %1714  ;;  %v388_v40 = vadd.f32 1.0, %v1713_v37  ;;  %v1233_v37 = vld [vmem:[%s2245_s4 + $0x18] sm:$0xff] }
 0x2f1   :  { %v387_v41 = vadd.f32 1.0, %v1715_v38  ;;  %v1649_v38 = vpack.c.bf16 %v1233_v37, %v1232_v35 }
 0x2f2   :  { %1716 = vrcp.f32 %v388_v40 }
 0x2f3   :  { %1718 = vrcp.f32 %v387_v41 }
 0x2fc   :  { %v1717_v43 = vpop.eup %1716 }
 0x2fd   :  { %v394_v44 = vmul.f32 2.0, %v1717_v43  ;;  %v1719_v46 = vpop.eup %1718 }
 0x2fe   :  { %v403_v53 = vmul.f32 %v1719_v46, %v401_v51 }
 0x2ff   :  { %v1424_v45 = vadd.f32 -1.0, %v394_v44  ;;  %v1235_v44 = vld [vmem:[%s2245_s4 + $0x28] sm:$0xff] }
 0x301   :  { %v398_v48 = vsel %vm250_vm1, %v1424_v45, %v1717_v43  ;;  %v1234_v43 = vld [vmem:[%s2245_s4 + $0x20] sm:$0xff] }
 0x302   :  { %v404_v50 = vmul.f32 %v1719_v46, %v398_v48  ;;  %v1653_v46 = vpack.c.bf16 %v1235_v44, %v1234_v43  ;;  %v182_v44 = vadd.f32 %v2026_v13, %v1923_v15 }
 0x304   :  { %406 = vrot.lane.b32.xlu0 %v404_v50, %s1845_s1  ;;  %v1237_v50 = vld [vmem:[%s2245_s4 + $0x38] sm:$0xff] }
 0x376   :  { %v407_v54 = vpop.permute.xlu0 %406 }
 0x377   :  { %v409_v55 = vadd.f32 %v407_v54, %v403_v53 }
 0x379   :  { %1720 = vtanh.f32 %v409_v55 }
 0x383   :  { %v1721_v57 = vpop.eup %1720 }
 0x384   :  { %v411_v58 = vmul.f32 %v1721_v57, %v398_v48  ;;  %v1236_v48 = vld [vmem:[%s2245_s4 + $0x30] sm:$0xff] }
 0x385   :  { %v1657_v51 = vpack.c.bf16 %v1237_v50, %v1236_v48 }
 0x386   :  { %413 = vrot.lane.b32.xlu1 %v411_v58, %s1845_s1  ;;  %v176_v58 = vadd.f32 %v2022_v11, %v1923_v15 }
 0x3f8   :  { %v414_v59 = vpop.permute.xlu1 %413 }
 0x3f9   :  { %416 = vst.msk [vmem:[#allocation3] sm:$0xff] %vm302_vm3, %v414_v59  ;;  %1425 = vmatmul.mubr.msk.f32.vlgmr.msra.gmra.mrb[4].mxu1 %vm302_vm3, %v414_v59  ;;  %v178_v59 = vadd.f32 %v2024_v12, %v1925_v16 }
 0x3fa   :  { %1648 = vmatpush3.bf16.msra.mxu1 %v1645_v36 }
 0x3fb   :  { %1650 = vmatprep.subr.bf16.mxu1 %v1649_v38 }
 0x3fe   :  { %1652 = vmatpush3.bf16.msra.mxu1 %v1649_v38 }
 0x3ff   :  { %1654 = vmatprep.subr.bf16.mxu1 %v1653_v46 }
 0x400   :  { %v1222_v60 = vld [vmem:[#allocation3] sm:$0xff] }
 0x401   :  { %1501 = vmatprep.mubr.msk.f32.mxu1 %vm302_vm3, %v1222_v60 }
 0x402   :  { %1656 = vmatpush3.bf16.msra.mxu1 %v1653_v46 }
 0x403   :  { %1658 = vmatprep.subr.bf16.mxu1 %v1657_v51 }
 0x406   :  { %1660 = vmatpush3.bf16.msra.mxu1 %v1657_v51 }
 0x4cc   :  { %v490_v61 = vpop.f32.mrb[4].mxu1 }
 0x4cd   :  { %v1663_v63 = vadd.f32 %v490_v61, %v1923_v15  ;;  %v492_v1 = vpop.f32.mrb[5].mxu1 }
 0x4ce   :  { %v1664_v2 = vadd.f32 %v492_v1, %v1925_v16 }
 0x4cf   :  { %v1426_v5 = vmul.f32 -1.442695, %v1663_v63 }
 0x4d0   :  { %v498_v4 = vmul.f32 %v1664_v2, %v1931_v21 }
 0x4d2   :  { %v1427_v6 = vmul.f32 -1.442695, %v498_v4 }
 0x4d4   :  { %1722 = vpow2.f32 %v1427_v6  ;;  %v2118_v6 = vld [vmem:[%s2246_s5] ss:$0 sm:$0xff]  ;;  %s1846_s5 = smov [#allocation7]  }
 0x4d5   :  { %1724 = vpow2.f32 %v1426_v5  ;;  %s1387_s27 = sshll.u32 %s1846_s5, 4  ;;  %s1388_s27 = int_to_ptr.vmem [resolvable:$true] %s1387_s27 }
 0x4d6   :  { %s1814_s28 = scalar_lea.vmem %s1388_s27, 1024  ;;  %p1819_p9 = scmp.lt.s32.totalorder %s1388_s27, %s1388_s27 }
 0x4d7   :  { %p1815_p8 = scmp.ne.s32.totalorder %s1388_s27, %s1814_s28  ;;  %p1820_p10 = scmp.lt.s32.totalorder %s1814_s28, %s1814_s28 }
 0x4d9   :  { %p1821_p11 = por %p1820_p10, %p1819_p9 }
 0x4db   :  { %p1822_p12 = pnand %p1821_p11, %p1815_p8 }
 0x4de   :  { %v1723_v7 = vpop.eup %1722 }
 0x4df   :  { %v1725_v8 = vpop.eup %1724  ;;  %v506_v9 = vadd.f32 1.0, %v1723_v7 }
 0x4e0   :  { %v505_v18 = vadd.f32 1.0, %v1725_v8 }
 0x4e1   :  { %1726 = vrcp.f32 %v506_v9 }
 0x4e2   :  { %1728 = vrcp.f32 %v505_v18 }
 0x4eb   :  { %v1727_v20 = vpop.eup %1726 }
 0x4ec   :  { %v512_v23 = vmul.f32 2.0, %v1727_v20  ;;  %v1729_v30 = vpop.eup %1728 }
 0x4ed   :  { %v517_v40 = vmul.f32 %v1729_v30, %v409_v55 }
 0x4ee   :  { %v1429_v24 = vadd.f32 -1.0, %v512_v23 }
 0x4f0   :  { %v516_v31 = vsel %vm250_vm1, %v1429_v24, %v1727_v20 }
 0x4f1   :  { %v518_v32 = vmul.f32 %v1729_v30, %v516_v31 }
 0x4f3   :  { %520 = vrot.lane.b32.xlu0 %v518_v32, %s1845_s1 }
 0x565   :  { %v521_v41 = vpop.permute.xlu0 %520 }
 0x566   :  { %v523_v45 = vadd.f32 %v521_v41, %v517_v40 }
 0x568   :  { %1730 = vtanh.f32 %v523_v45 }
 0x572   :  { %v1731_v53 = vpop.eup %1730 }
 0x573   :  { %v525_v54 = vmul.f32 %v1731_v53, %v516_v31 }
 0x575   :  { %527 = vrot.lane.b32.xlu1 %v525_v54, %s1845_s1 }
 0x5e7   :  { %v528_v55 = vpop.permute.xlu1 %527 }
 0x5e8   :  { %531 = vst.msk [vmem:[#allocation3 + $0x8] sm:$0xff] %vm302_vm3, %v528_v55  ;;  %1430 = vmatmul.mubr.msk.f32.vlgmr.msra.gmra.mrb[0].mxu0 %vm302_vm3, %v528_v55 }
 0x5e9   :  { %1568 = vmatpush1.bf16.msra.mxu0 %v1949_v42  ;;  %718 = vmatprep.mubr.f32.mxu0 %v1843_v0 }
 0x5ea   :  { %1570 = vmatprep.subr.bf16.mxu0 %v1957_v47 }
 0x5ed   :  { %1572 = vmatpush1.bf16.msra.mxu0 %v1960_v49 }
 0x5ee   :  { %1574 = vmatprep.subr.bf16.mxu0 %v1964_v52 }
 0x5ef   :  { %v1223_v57 = vld [vmem:[#allocation3 + $0x8] sm:$0xff] }
 0x5f0   :  { %1502 = vmatmul.mubr.msk.f32.vlgmr.msra.gmra.mrb[18].mxu1 %vm302_vm3, %v1223_v57 }
 0x5f1   :  { %1576 = vmatpush1.bf16.msra.mxu0 %v1974_v56 }
 0x5f2   :  { %1578 = vmatprep.subr.bf16.mxu0 %v1998_v62 }
 0x5f5   :  { %1580 = vmatpush1.bf16.msra.mxu0 %v2003_v3 }
 0x5f6   :  { %1582 = vmatprep.subr.bf16.mxu0 %v1944_v39 }
 0x6bb   :  { %v605_v60 = vpop.f32.mrb[0].mxu0 }
 0x6bc   :  { %v610_v61 = vadd.f32 %v605_v60, %v176_v58  ;;  %v607_v63 = vpop.f32.mrb[1].mxu0 }
 0x6bd   :  { %v611_v1 = vadd.f32 %v607_v63, %v178_v59 }
 0x6be   :  { %v1431_v4 = vmul.f32 -1.442695, %v610_v61 }
 0x6bf   :  { %v613_v2 = vmul.f32 %v611_v1, %v1931_v21 }
 0x6c1   :  { %v1432_v5 = vmul.f32 -1.442695, %v613_v2 }
 0x6c3   :  { %1732 = vpow2.f32 %v1432_v5  ;;  %v1503_v7 = vpop.f32.mrb[18].mxu1 }
 0x6c4   :  { %1734 = vpow2.f32 %v1431_v4  ;;  %v1341_v11 = vadd.f32 %v1503_v7, %v2118_v6  ;;  %v1335_v8 = vpop.f32.mrb[19].mxu1 }
 0x6c5   :  { %v1336_v12 = vadd.f32 %v2118_v6, %v1335_v8 }
 0x6c6   :  { %1375 = vst [vmem:[#allocation7 + $0x8] sm:$0xff] %v1341_v11 }
 0x6c7   :  { %1374 = vst [vmem:[#allocation7] sm:$0xff] %v1336_v12 }
 0x6cd   :  { %v1733_v9 = vpop.eup %1732 }
 0x6ce   :  { %v1735_v18 = vpop.eup %1734  ;;  %v621_v20 = vadd.f32 1.0, %v1733_v9 }
 0x6cf   :  { %v620_v23 = vadd.f32 1.0, %v1735_v18  ;;  %v188_v18 = vadd.f32 %v2031_v19, %v1923_v15 }
 0x6d0   :  { %1736 = vrcp.f32 %v621_v20  ;;  %v190_v20 = vadd.f32 %v2033_v22, %v1925_v16 }
 0x6d1   :  { %1738 = vrcp.f32 %v620_v23 }
 0x6da   :  { %v1737_v24 = vpop.eup %1736 }
 0x6db   :  { %v627_v30 = vmul.f32 2.0, %v1737_v24  ;;  %v1739_v32 = vpop.eup %1738 }
 0x6dc   :  { %v632_v35 = vmul.f32 %v1739_v32, %v523_v45  ;;  %v184_v45 = vadd.f32 %v2028_v17, %v1925_v16 }
 0x6dd   :  { %v1434_v31 = vadd.f32 -1.0, %v627_v30 }
 0x6df   :  { %v631_v33 = vsel %vm250_vm1, %v1434_v31, %v1737_v24 }
 0x6e0   :  { %v633_v34 = vmul.f32 %v1739_v32, %v631_v33 }
 0x6e2   :  { %635 = vrot.lane.b32.xlu0 %v633_v34, %s1845_s1 }
 0x754   :  { %v636_v36 = vpop.permute.xlu0 %635 }
 0x755   :  { %v638_v37 = vadd.f32 %v636_v36, %v632_v35 }
 0x757   :  { %1740 = vtanh.f32 %v638_v37 }
 0x761   :  { %v1741_v38 = vpop.eup %1740 }
 0x762   :  { %v640_v40 = vmul.f32 %v1741_v38, %v631_v33 }
 0x764   :  { %642 = vrot.lane.b32.xlu1 %v640_v40, %s1845_s1 }
 0x7d6   :  { %v643_v41 = vpop.permute.xlu1 %642 }
 0x7d7   :  { %646 = vst.msk [vmem:[#allocation3 + $0x10] sm:$0xff] %vm302_vm3, %v643_v41  ;;  %1435 = vmatmul.mubr.msk.f32.vlgmr.msra.gmra.mrb[2].mxu0 %vm302_vm3, %v643_v41 }
 0x7d8   :  { %1584 = vmatpush1.bf16.msra.mxu0 %v1949_v42  ;;  %833 = vmatprep.mubr.f32.mxu0 %v1843_v0 }
 0x7d9   :  { %1586 = vmatprep.subr.bf16.mxu0 %v1957_v47 }
 0x7dc   :  { %1588 = vmatpush1.bf16.msra.mxu0 %v1960_v49 }
 0x7dd   :  { %1590 = vmatprep.subr.bf16.mxu0 %v1964_v52 }
 0x7de   :  { %v1224_v43 = vld [vmem:[#allocation3 + $0x10] sm:$0xff] }
 0x7df   :  { %1504 = vmatprep.mubr.msk.f32.mxu1 %vm302_vm3, %v1224_v43 }
 0x7e0   :  { %1592 = vmatpush1.bf16.msra.mxu0 %v1974_v56 }
 0x7e1   :  { %1594 = vmatprep.subr.bf16.mxu0 %v1998_v62 }
 0x7e4   :  { %1596 = vmatpush1.bf16.msra.mxu0 %v2003_v3 }
 0x7e5   :  { %1598 = vmatprep.subr.bf16.mxu0 %v1944_v39 }
 0x8aa   :  { %v720_v46 = vpop.f32.mrb[2].mxu0 }
 0x8ab   :  { %v725_v48 = vadd.f32 %v720_v46, %v182_v44  ;;  %v722_v50 = vpop.f32.mrb[3].mxu0 }
 0x8ac   :  { %v726_v51 = vadd.f32 %v722_v50, %v184_v45 }
 0x8ad   :  { %v1436_v54 = vmul.f32 -1.442695, %v725_v48 }
 0x8ae   :  { %v728_v53 = vmul.f32 %v726_v51, %v1931_v21 }
 0x8b0   :  { %v1437_v55 = vmul.f32 -1.442695, %v728_v53 }
 0x8b2   :  { %1742 = vpow2.f32 %v1437_v55 }
 0x8b3   :  { %1744 = vpow2.f32 %v1436_v54 }
 0x8bc   :  { %v1743_v57 = vpop.eup %1742 }
 0x8bd   :  { %v1745_v58 = vpop.eup %1744  ;;  %v736_v59 = vadd.f32 1.0, %v1743_v57 }
 0x8be   :  { %v735_v60 = vadd.f32 1.0, %v1745_v58 }
 0x8bf   :  { %1746 = vrcp.f32 %v736_v59 }
 0x8c0   :  { %1748 = vrcp.f32 %v735_v60  ;;  %v194_v60 = vadd.f32 %v2045_v10, %v1923_v15 }
 0x8c9   :  { %v1747_v13 = vpop.eup %1746 }
 0x8ca   :  { %v742_v61 = vmul.f32 2.0, %v1747_v13  ;;  %v1749_v17 = vpop.eup %1748 }
 0x8cb   :  { %v747_v4 = vmul.f32 %v1749_v17, %v638_v37 }
 0x8cc   :  { %v1439_v63 = vadd.f32 -1.0, %v742_v61 }
 0x8ce   :  { %v746_v1 = vsel %vm250_vm1, %v1439_v63, %v1747_v13  ;;  %v196_v13 = vadd.f32 %v2047_v25, %v1925_v16 }
 0x8cf   :  { %v748_v2 = vmul.f32 %v1749_v17, %v746_v1 }
 0x8d1   :  { %750 = vrot.lane.b32.xlu0 %v748_v2, %s1845_s1 }
 0x943   :  { %v751_v5 = vpop.permute.xlu0 %750 }
 0x944   :  { %v753_v7 = vadd.f32 %v751_v5, %v747_v4 }
 0x946   :  { %1750 = vtanh.f32 %v753_v7 }
 0x950   :  { %v1751_v11 = vpop.eup %1750 }
 0x951   :  { %v755_v8 = vmul.f32 %v1751_v11, %v746_v1 }
 0x953   :  { %757 = vrot.lane.b32.xlu1 %v755_v8, %s1845_s1 }
 0x9c5   :  { %v758_v12 = vpop.permute.xlu1 %757 }
 0x9c6   :  { %761 = vst.msk [vmem:[#allocation3 + $0x18] sm:$0xff] %vm302_vm3, %v758_v12  ;;  %1440 = vmatmul.mubr.msk.f32.vlgmr.msra.gmra.mrb[4].mxu0 %vm302_vm3, %v758_v12 }
 0x9c7   :  { %1600 = vmatpush1.bf16.msra.mxu0 %v1949_v42  ;;  %948 = vmatprep.mubr.f32.mxu0 %v1843_v0 }
 0x9c8   :  { %1602 = vmatprep.subr.bf16.mxu0 %v1957_v47 }
 0x9cb   :  { %1604 = vmatpush1.bf16.msra.mxu0 %v1960_v49 }
 0x9cc   :  { %1606 = vmatprep.subr.bf16.mxu0 %v1964_v52 }
 0x9cd   :  { %v1225_v9 = vld [vmem:[#allocation3 + $0x18] sm:$0xff] }
 0x9ce   :  { %1505 = vmatmul.mubr.msk.f32.gmra.mrb[20].mxu1 %vm302_vm3, %v1225_v9 }
 0x9cf   :  { %1608 = vmatpush1.bf16.msra.mxu0 %v1974_v56 }
 0x9d0   :  { %1610 = vmatprep.subr.bf16.mxu0 %v1998_v62 }
 0x9d3   :  { %1612 = vmatpush1.bf16.msra.mxu0 %v2003_v3 }
 0x9d4   :  { %1614 = vmatprep.subr.bf16.mxu0 %v1944_v39 }
 0xa99   :  { %v835_v23 = vpop.f32.mrb[4].mxu0 }
 0xa9a   :  { %v840_v24 = vadd.f32 %v835_v23, %v188_v18  ;;  %v837_v30 = vpop.f32.mrb[5].mxu0 }
 0xa9b   :  { %v841_v31 = vadd.f32 %v837_v30, %v190_v20 }
 0xa9c   :  { %v1441_v33 = vmul.f32 -1.442695, %v840_v24 }
 0xa9d   :  { %v843_v32 = vmul.f32 %v841_v31, %v1931_v21 }
 0xa9f   :  { %v1442_v34 = vmul.f32 -1.442695, %v843_v32 }
 0xaa1   :  { %1752 = vpow2.f32 %v1442_v34  ;;  %v1506_v35 = vpop.f32.mrb[20].mxu1 }
 0xaa2   :  { %1754 = vpow2.f32 %v1441_v33  ;;  %v1351_v36 = vadd.f32 %v1506_v35, %v2118_v6  ;;  %v1345_v37 = vpop.f32.mrb[21].mxu1 }
 0xaa3   :  { %v1346_v38 = vadd.f32 %v2118_v6, %v1345_v37 }
 0xaa4   :  { %1377 = vst [vmem:[#allocation7 + $0x18] sm:$0xff] %v1351_v36 }
 0xaa5   :  { %1376 = vst [vmem:[#allocation7 + $0x10] sm:$0xff] %v1346_v38 }
 0xaab   :  { %v1753_v19 = vpop.eup %1752 }
 0xaac   :  { %v1755_v22 = vpop.eup %1754  ;;  %v851_v40 = vadd.f32 1.0, %v1753_v19 }
 0xaad   :  { %v850_v41 = vadd.f32 1.0, %v1755_v22 }
 0xaae   :  { %1756 = vrcp.f32 %v851_v40 }
 0xaaf   :  { %1758 = vrcp.f32 %v850_v41 }
 0xab8   :  { %v1757_v43 = vpop.eup %1756 }
 0xab9   :  { %v857_v44 = vmul.f32 2.0, %v1757_v43  ;;  %v1759_v46 = vpop.eup %1758 }
 0xaba   :  { %v862_v51 = vmul.f32 %v1759_v46, %v753_v7 }
 0xabb   :  { %v1444_v45 = vadd.f32 -1.0, %v857_v44 }
 0xabd   :  { %v861_v48 = vsel %vm250_vm1, %v1444_v45, %v1757_v43 }
 0xabe   :  { %v863_v50 = vmul.f32 %v1759_v46, %v861_v48 }
 0xac0   :  { %865 = vrot.lane.b32.xlu0 %v863_v50, %s1845_s1 }
 0xb32   :  { %v866_v53 = vpop.permute.xlu0 %865 }
 0xb33   :  { %v868_v54 = vadd.f32 %v866_v53, %v862_v51 }
 0xb35   :  { %1760 = vtanh.f32 %v868_v54 }
 0xb3f   :  { %v1761_v55 = vpop.eup %1760 }
 0xb40   :  { %v870_v57 = vmul.f32 %v1761_v55, %v861_v48 }
 0xb42   :  { %872 = vrot.lane.b32.xlu1 %v870_v57, %s1845_s1 }
 0xbb4   :  { %v873_v58 = vpop.permute.xlu1 %872 }
 0xbb5   :  { %876 = vst.msk [vmem:[#allocation3 + $0x20] sm:$0xff] %vm302_vm3, %v873_v58  ;;  %1445 = vmatmul.mubr.msk.f32.vlgmr.msra.gmra.mrb[6].mxu0 %vm302_vm3, %v873_v58 }
 0xbb6   :  { %1616 = vmatpush1.bf16.msra.mxu0 %v1949_v42  ;;  %1063 = vmatprep.mubr.f32.mxu0 %v1843_v0 }
 0xbb7   :  { %1618 = vmatprep.subr.bf16.mxu0 %v1957_v47 }
 0xbba   :  { %1620 = vmatpush1.bf16.msra.mxu0 %v1960_v49 }
 0xbbb   :  { %1622 = vmatprep.subr.bf16.mxu0 %v1964_v52 }
 0xbbc   :  { %v1226_v59 = vld [vmem:[#allocation3 + $0x20] sm:$0xff] }
 0xbbd   :  { %1507 = vmatprep.mubr.msk.f32.mxu1 %vm302_vm3, %v1226_v59  ;;  %v206_v59 = vadd.f32 %v2053_v28, %v1923_v15 }
 0xbbe   :  { %1624 = vmatpush1.bf16.msra.mxu0 %v1974_v56 }
 0xbbf   :  { %1626 = vmatprep.subr.bf16.mxu0 %v1998_v62 }
 0xbc2   :  { %1628 = vmatpush1.bf16.msra.mxu0 %v2003_v3 }
 0xbc3   :  { %1630 = vmatprep.subr.bf16.mxu0 %v1944_v39 }
 0xc88   :  { %v950_v61 = vpop.f32.mrb[6].mxu0 }
 0xc89   :  { %v955_v63 = vadd.f32 %v950_v61, %v194_v60  ;;  %v952_v17 = vpop.f32.mrb[7].mxu0  ;;  %v208_v60 = vadd.f32 %v2055_v29, %v1925_v16 }
 0xc8a   :  { %v956_v1 = vadd.f32 %v952_v17, %v196_v13 }
 0xc8b   :  { %v1446_v4 = vmul.f32 -1.442695, %v955_v63 }
 0xc8c   :  { %v958_v2 = vmul.f32 %v956_v1, %v1931_v21 }
 0xc8e   :  { %v1447_v5 = vmul.f32 -1.442695, %v958_v2 }
 0xc90   :  { %1762 = vpow2.f32 %v1447_v5 }
 0xc91   :  { %1764 = vpow2.f32 %v1446_v4 }
 0xc9a   :  { %v1763_v7 = vpop.eup %1762 }
 0xc9b   :  { %v1765_v11 = vpop.eup %1764  ;;  %v966_v8 = vadd.f32 1.0, %v1763_v7 }
 0xc9c   :  { %v965_v39 = vadd.f32 1.0, %v1765_v11 }
 0xc9d   :  { %1766 = vrcp.f32 %v966_v8 }
 0xc9e   :  { %1768 = vrcp.f32 %v965_v39 }
 0xca7   :  { %v1767_v10 = vpop.eup %1766 }
 0xca8   :  { %v972_v12 = vmul.f32 2.0, %v1767_v10  ;;  %v1769_v25 = vpop.eup %1768 }
 0xca9   :  { %v977_v23 = vmul.f32 %v1769_v25, %v868_v54 }
 0xcaa   :  { %v1449_v9 = vadd.f32 -1.0, %v972_v12 }
 0xcac   :  { %v976_v18 = vsel %vm250_vm1, %v1449_v9, %v1767_v10 }
 0xcad   :  { %v978_v20 = vmul.f32 %v1769_v25, %v976_v18 }
 0xcaf   :  { %980 = vrot.lane.b32.xlu0 %v978_v20, %s1845_s1 }
 0xd21   :  { %v981_v24 = vpop.permute.xlu0 %980 }
 0xd22   :  { %v983_v30 = vadd.f32 %v981_v24, %v977_v23 }
 0xd24   :  { %1770 = vtanh.f32 %v983_v30 }
 0xd2e   :  { %v1771_v31 = vpop.eup %1770 }
 0xd2f   :  { %v985_v32 = vmul.f32 %v1771_v31, %v976_v18 }
 0xd31   :  { %987 = vrot.lane.b32.xlu1 %v985_v32, %s1845_s1 }
 0xda3   :  { %v988_v33 = vpop.permute.xlu1 %987 }
 0xda4   :  { %991 = vst.msk [vmem:[#allocation3 + $0x28] sm:$0xff] %vm302_vm3, %v988_v33  ;;  %1450 = vmatmul.mubr.msk.f32.vlgmr.msra.gmra.mrb[8].mxu0 %vm302_vm3, %v988_v33 }
 0xda5   :  { %1632 = vmatpush1.bf16.msra.mxu0 %v1949_v42  ;;  %1178 = vmatprep.mubr.f32.mxu0 %v1843_v0  ;;  %v200_v42 = vadd.f32 %v2049_v26, %v1923_v15  ;;  %v202_v0 = vadd.f32 %v2051_v27, %v1925_v16 }
 0xda6   :  { %1634 = vmatprep.subr.bf16.mxu0 %v1957_v47 }
 0xda9   :  { %1636 = vmatpush1.bf16.msra.mxu0 %v1960_v49 }
 0xdaa   :  { %1638 = vmatprep.subr.bf16.mxu0 %v1964_v52 }
 0xdab   :  { %v1227_v34 = vld [vmem:[#allocation3 + $0x28] sm:$0xff] }
 0xdac   :  { %1508 = vmatmul.mubr.msk.f32.gmra.mrb[22].mxu1 %vm302_vm3, %v1227_v34 }
 0xdad   :  { %1640 = vmatpush1.bf16.msra.mxu0 %v1974_v56 }
 0xdae   :  { %1642 = vmatprep.subr.bf16.mxu0 %v1998_v62 }
 0xdb1   :  { %1644 = vmatpush1.bf16.msra.mxu0 %v2003_v3 }
 0xe77   :  { %v1065_v47 = vpop.f32.mrb[8].mxu0 }
 0xe78   :  { %v1070_v35 = vadd.f32 %v1065_v47, %v200_v42  ;;  %v1067_v49 = vpop.f32.mrb[9].mxu0 }
 0xe79   :  { %v1071_v36 = vadd.f32 %v1067_v49, %v202_v0 }
 0xe7a   :  { %v1451_v37 = vmul.f32 -1.442695, %v1070_v35 }
 0xe7b   :  { %v1073_v52 = vmul.f32 %v1071_v36, %v1931_v21 }
 0xe7d   :  { %v1452_v38 = vmul.f32 -1.442695, %v1073_v52 }
 0xe7f   :  { %1772 = vpow2.f32 %v1452_v38  ;;  %v1509_v56 = vpop.f32.mrb[22].mxu1 }
 0xe80   :  { %1774 = vpow2.f32 %v1451_v37  ;;  %v1361_v62 = vadd.f32 %v1509_v56, %v2118_v6  ;;  %v1355_v3 = vpop.f32.mrb[23].mxu1 }
 0xe81   :  { %v1356_v19 = vadd.f32 %v2118_v6, %v1355_v3 }
 0xe82   :  { %1379 = vst [vmem:[#allocation7 + $0x28] sm:$0xff] %v1361_v62 }
 0xe83   :  { %1378 = vst [vmem:[#allocation7 + $0x20] sm:$0xff] %v1356_v19 }
 0xe89   :  { %v1773_v26 = vpop.eup %1772 }
 0xe8a   :  { %v1775_v27 = vpop.eup %1774  ;;  %v1081_v22 = vadd.f32 1.0, %v1773_v26 }
 0xe8b   :  { %v1080_v40 = vadd.f32 1.0, %v1775_v27 }
 0xe8c   :  { %1776 = vrcp.f32 %v1081_v22 }
 0xe8d   :  { %1778 = vrcp.f32 %v1080_v40 }
 0xe96   :  { %v1777_v41 = vpop.eup %1776 }
 0xe97   :  { %v1087_v43 = vmul.f32 2.0, %v1777_v41  ;;  %v1779_v45 = vpop.eup %1778 }
 0xe98   :  { %v1092_v50 = vmul.f32 %v1779_v45, %v983_v30 }
 0xe99   :  { %v1454_v44 = vadd.f32 -1.0, %v1087_v43 }
 0xe9b   :  { %v1091_v46 = vsel %vm250_vm1, %v1454_v44, %v1777_v41 }
 0xe9c   :  { %v1093_v48 = vmul.f32 %v1779_v45, %v1091_v46 }
 0xe9e   :  { %1095 = vrot.lane.b32.xlu0 %v1093_v48, %s1845_s1 }
 0xf10   :  { %v1096_v51 = vpop.permute.xlu0 %1095 }
 0xf11   :  { %v1098_v53 = vadd.f32 %v1096_v51, %v1092_v50 }
 0xf13   :  { %1780 = vtanh.f32 %v1098_v53 }
 0xf1d   :  { %v1781_v54 = vpop.eup %1780 }
 0xf1e   :  { %v1100_v55 = vmul.f32 %v1781_v54, %v1091_v46 }
 0xf20   :  { %1102 = vrot.lane.b32.xlu1 %v1100_v55, %s1845_s1 }
 0xf92   :  { %v1103_v57 = vpop.permute.xlu1 %1102 }
 0xf93   :  { %1106 = vst.msk [vmem:[#allocation3 + $0x30] sm:$0xff] %vm302_vm3, %v1103_v57  ;;  %1455 = vmatmul.mubr.msk.f32.vlgmr.msra.gmra.mrb[10].mxu0 %vm302_vm3, %v1103_v57 }
 0xf9a   :  { %v1228_v58 = vld [vmem:[#allocation3 + $0x30] sm:$0xff] }
 0xf9b   :  { %1510 = vmatprep.mubr.msk.f32.mxu1 %vm302_vm3, %v1228_v58 }
0x1066   :  { %v1180_v13 = vpop.f32.mrb[10].mxu0 }
0x1067   :  { %v1185_v61 = vadd.f32 %v1180_v13, %v206_v59  ;;  %v1182_v63 = vpop.f32.mrb[11].mxu0 }
0x1068   :  { %v1186_v17 = vadd.f32 %v1182_v63, %v208_v60 }
0x1069   :  { %v1456_v2 = vmul.f32 -1.442695, %v1185_v61 }
0x106a   :  { %v1188_v1 = vmul.f32 %v1186_v17, %v1931_v21 }
0x106c   :  { %v1457_v4 = vmul.f32 -1.442695, %v1188_v1 }
0x106e   :  { %1782 = vpow2.f32 %v1457_v4 }
0x106f   :  { %1784 = vpow2.f32 %v1456_v2 }
0x1078   :  { %v1783_v5 = vpop.eup %1782 }
0x1079   :  { %v1785_v7 = vpop.eup %1784  ;;  %v1196_v11 = vadd.f32 1.0, %v1783_v5 }
0x107a   :  { %v1195_v8 = vadd.f32 1.0, %v1785_v7 }
0x107b   :  { %1786 = vrcp.f32 %v1196_v11 }
0x107c   :  { %1788 = vrcp.f32 %v1195_v8 }
0x1085   :  { %v1787_v15 = vpop.eup %1786 }
0x1086   :  { %v1202_v28 = vmul.f32 2.0, %v1787_v15  ;;  %v1789_v16 = vpop.eup %1788 }
0x1087   :  { %v1207_v21 = vmul.f32 %v1789_v16, %v1098_v53 }
0x1088   :  { %v1459_v39 = vadd.f32 -1.0, %v1202_v28 }
0x108a   :  { %v1206_v29 = vsel %vm250_vm1, %v1459_v39, %v1787_v15 }
0x108b   :  { %v1208_v10 = vmul.f32 %v1789_v16, %v1206_v29 }
0x108d   :  { %1210 = vrot.lane.b32.xlu0 %v1208_v10, %s1845_s1 }
0x10ff   :  { %v1211_v12 = vpop.permute.xlu0 %1210 }
0x1100   :  { %v1213_v9 = vadd.f32 %v1211_v12, %v1207_v21 }
0x1102   :  { %1790 = vtanh.f32 %v1213_v9 }
0x110c   :  { %v1791_v25 = vpop.eup %1790 }
0x110d   :  { %v1215_v18 = vmul.f32 %v1791_v25, %v1206_v29 }
0x110f   :  { %1217 = vrot.lane.b32.xlu1 %v1215_v18, %s1845_s1 }
0x1181   :  { %v1218_v20 = vpop.permute.xlu1 %1217 }
0x1182   :  { %1221 = vst.msk [vmem:[#allocation3 + $0x38] sm:$0xff] %vm302_vm3, %v1218_v20 }
0x1189   :  { %v1229_v23 = vld [vmem:[#allocation3 + $0x38] sm:$0xff] }
0x118a   :  { %1511 = vmatmul.mubr.msk.f32.gmra.mrb[24].mxu1 %vm302_vm3, %v1229_v23 }
0x125d   :  { %v1512_v14 = vpop.f32.mrb[24].mxu1 }
0x125e   :  { %v1371_v24 = vadd.f32 %v1512_v14, %v2118_v6  ;;  %v1365_v30 = vpop.f32.mrb[25].mxu1 }
0x125f   :  { %v1366_v31 = vadd.f32 %v2118_v6, %v1365_v30 }
0x1260   :  { %1381 = vst [vmem:[#allocation7 + $0x38] sm:$0xff] %v1371_v24 }
0x1261   :  { %1380 = vst [vmem:[#allocation7 + $0x30] sm:$0xff] %v1366_v31 }
0x1262   :  { %1825 = shalt.err (!%p1822_p12)
}
0x1263   :  { %s1826_s30 = scalar_lea.hbm %s2247_s6, 1024 }
0x1264   :  { %p1827_p13 = scmp.ne.s32.totalorder %s2247_s6, %s1826_s30  ;;  %p1830_p0 = scmp.lt.u32.totalorder %s1826_s30, %s2247_s6 }
0x1266   :  { %p1832_p1 = pnand %p1830_p0, %p1827_p13 }
0x1268   :  { %1835 = shalt.err (!%p1832_p1)
}
0x1269   :  { %s1847_s11 = smov 128   ;;  %s1848_s12 = smov 8  }
0x126a   :  { %1393 = dma.vmem_to_hbm [thread:$0]  %s1388_s27, 1024, %s2247_s6, [#allocation6], %s1847_s11, %s1847_s11, %s1848_s12  }
0x126b   :  { %1838 = dma.done.wait [#allocation6], 1024  }
0x126c   :  { %1839 = vsyncadd [#allocation6], 4294966272 }
0x126d   :  { %1397 = vsyncpa [#allocation5], 1 }
0x126e   :  { %1398 = vsyncpa [#allocation6], 1 }

</bundles_post_ra>
